<compile_context>
chip_gen: v7x
topology: tpu7x:2x2x1
jax: 0.10.0
libtpu: 0.0.40
codegen_flags: <defaults>
</compile_context>

<pallas_src>
import jax
import jax.numpy as jnp
from jax import lax
from jax.experimental import pallas as pl
from jax.experimental.pallas import tpu as pltpu


_FULL_UNROLL_T = 32   # fully unroll the time loop up to this T; fori_loop beyond


def _make_kernel(T, H, matmul_dtype):
    def kernel(x_ref, wih_ref, whh_ref, bg_ref, w1_ref, b1_ref, w2_ref, b2_ref,
               out_ref, xg_ref):
        # x_ref  : (T, Bb, D)   matmul_dtype  time-major input block
        # wih_ref: (D, 4H)      matmul_dtype  W_ih^T
        # whh_ref: (H, 4H)      f32           W_hh^T (f32: tiny, keeps recurrence exact-ish)
        # bg_ref : (1, 4H)      f32           b_ih + b_hh
        # w1_ref : (H, F1) / b1_ref (1, F1) / w2_ref (F1, C) / b2_ref (1, C)
        # xg_ref : (T, Bb, 4H)  f32 scratch   precomputed input projection
        Bb = x_ref.shape[1]
        D = x_ref.shape[2]

        # ---- one-shot input projection: one big MXU-friendly matmul ----
        x_all = x_ref[...].reshape(T * Bb, D)
        xg = jnp.dot(x_all, wih_ref[...], preferred_element_type=jnp.float32)
        xg = xg + bg_ref[...]                       # fused bias added exactly once
        xg_ref[...] = xg.reshape(T, Bb, 4 * H)

        whh = whh_ref[...]                          # hoisted out of the time loop

        def step(t, carry):
            h, c = carry
            gates = xg_ref[t] + jnp.dot(h, whh, preferred_element_type=jnp.float32)
            # PyTorch gate order along the 4H axis: [i, f, g, o]
            i_g = jax.nn.sigmoid(gates[:, 0 * H:1 * H])
            f_g = jax.nn.sigmoid(gates[:, 1 * H:2 * H])
            g_g = jnp.tanh(gates[:, 2 * H:3 * H])
            o_g = jax.nn.sigmoid(gates[:, 3 * H:4 * H])
            c_new = f_g * c + i_g * g_g
            h_new = o_g * jnp.tanh(c_new)
            return h_new, c_new

        h = jnp.zeros((Bb, H), jnp.float32)
        c = jnp.zeros((Bb, H), jnp.float32)
        if T <= _FULL_UNROLL_T:
            # Small static T: full unroll, every xg index is static.
            for t in range(T):
                h, c = step(t, (h, c))
        else:
            # Long sequences: one scheduled body, bounded live ranges.
            h, c = lax.fori_loop(0, T, step, (h, c), unroll=4)

        # ---- MLP head on h_T (hn.view(-1, H) with num_layers=1 is (B, H)) ----
        hid = jnp.maximum(h, 0.0)
        z = (jnp.dot(hid.astype(matmul_dtype), w1_ref[...],
                     preferred_element_type=jnp.float32) + b1_ref[...])
        z = jnp.maximum(z, 0.0)
        out = (jnp.dot(z.astype(matmul_dtype), w2_ref[...],
                       preferred_element_type=jnp.float32) + b2_ref[...])
        out_ref[...] = out

    return kernel


def net_iemocap_forward(x, w_ih, w_hh, b_ih, b_hh, w1, b1, w2, b2,
                        matmul_dtype=jnp.bfloat16, batch_block=None):
    """x: (B, T, D) float32. Weights in PyTorch layout:
       w_ih (4H, D), w_hh (4H, H), b_ih/b_hh (4H,), w1 (128, H), b1 (128,),
       w2 (C, 128), b2 (C,). Returns (B, C) float32.

       matmul_dtype: MXU operand dtype for the LARGE matmuls (input projection
       and head); the recurrent h @ W_hh stays f32. Default bf16 on all chips.
       batch_block: optional batch tile (must divide B; multiple of 8 unless
       == B). Only useful to shard a big batch across v7x's two TensorCores;
       default = whole batch, grid=(1,)."""
    B, T, D = x.shape
    H = w_hh.shape[1]
    F1 = w1.shape[0]
    C = w2.shape[0]

    if batch_block is None:
        batch_block = B
    assert B % batch_block == 0, "batch_block must divide B"
    assert batch_block == B or batch_block % 8 == 0, \
        "batch_block must equal B or be a multiple of 8"

    mb = jnp.dtype(matmul_dtype).itemsize

    # ---- weight prep (done once, outside the kernel) ----
    wih_t = jnp.transpose(w_ih).astype(matmul_dtype)        # (D, 4H)
    whh_t = jnp.transpose(w_hh).astype(jnp.float32)         # (H, 4H), stays f32
    bg = (b_ih + b_hh)[None, :].astype(jnp.float32)         # (1, 4H)
    w1_t = jnp.transpose(w1).astype(matmul_dtype)           # (H, F1)
    b1_r = b1[None, :].astype(jnp.float32)                  # (1, F1)
    w2_t = jnp.transpose(w2).astype(matmul_dtype)           # (F1, C)
    b2_r = b2[None, :].astype(jnp.float32)                  # (1, C)

    # Time-major input already in the MXU operand dtype (halves x DMA for bf16).
    # No lane padding: D as the last block dim equals the full array dim.
    x_tm = jnp.transpose(x, (1, 0, 2)).astype(matmul_dtype)  # (T, B, D)

    n_bb = B // batch_block

    # VMEM budget: double-buffered x block + f32 xg scratch + weights + output.
    est = (2 * T * batch_block * D * mb
           + T * batch_block * 4 * H * 4
           + 2 * (D * 4 * H * mb + H * 4 * H * 4 + H * F1 * mb + F1 * C * mb)
           + 2 * 4 * (4 * H + F1 + C)
           + 2 * batch_block * 128 * 4)
    vmem_limit = int(min(max(2 * est, 32 * 2 ** 20), 64 * 2 ** 20))

    def full_spec(shape):
        return pl.BlockSpec(shape, lambda i, _s=shape: tuple(0 for _ in _s))

    kernel = _make_kernel(T, H, matmul_dtype)

    return pl.pallas_call(
        kernel,
        out_shape=jax.ShapeDtypeStruct((B, C), jnp.float32),
        grid_spec=pltpu.PrefetchScalarGridSpec(
            num_scalar_prefetch=0,
            grid=(n_bb,),                                    # batch tiles only
            in_specs=[
                pl.BlockSpec((T, batch_block, D), lambda i: (0, i, 0)),
                full_spec((D, 4 * H)),
                full_spec((H, 4 * H)),
                full_spec((1, 4 * H)),
                full_spec((H, F1)),
                full_spec((1, F1)),
                full_spec((F1, C)),
                full_spec((1, C)),
            ],
            out_specs=pl.BlockSpec((batch_block, C), lambda i: (i, 0)),
            scratch_shapes=[pltpu.VMEM((T, batch_block, 4 * H), jnp.float32)],
        ),
        compiler_params=pltpu.CompilerParams(
            dimension_semantics=("parallel",) if n_bb > 1 else ("arbitrary",),
            vmem_limit_bytes=vmem_limit),
    )(x_tm, wih_t, whh_t, bg, w1_t, b1_r, w2_t, b2_r)


def net_iemocap_reference(x, w_ih, w_hh, b_ih, b_hh, w1, b1, w2, b2):
    """Pure-JAX reference matching torch.nn.LSTM semantics (for validation)."""
    B, T, D = x.shape
    H = w_hh.shape[1]

    def step(carry, x_t):
        h, c = carry
        gates = x_t @ w_ih.T + b_ih + h @ w_hh.T + b_hh
        i = jax.nn.sigmoid(gates[:, 0 * H:1 * H])
        f = jax.nn.sigmoid(gates[:, 1 * H:2 * H])
        g = jnp.tanh(gates[:, 2 * H:3 * H])
        o = jax.nn.sigmoid(gates[:, 3 * H:4 * H])
        c_new = f * c + i * g
        h_new = o * jnp.tanh(c_new)
        return (h_new, c_new), None

    h0 = jnp.zeros((B, H), jnp.float32)
    c0 = jnp.zeros((B, H), jnp.float32)
    (hn, _), _ = lax.scan(step, (h0, c0), jnp.transpose(x, (1, 0, 2)))
    out = jnp.maximum(hn, 0.0)
    out = jnp.maximum(out @ w1.T + b1, 0.0)
    return out @ w2.T + b2


def _make_params(key, D, H, F1, NC):
    keys = jax.random.split(key, 8)
    k = 1.0 / jnp.sqrt(jnp.float32(H))
    k2 = 1.0 / jnp.sqrt(jnp.float32(F1))
    w_ih = jax.random.uniform(keys[0], (4 * H, D), jnp.float32, -k, k)
    w_hh = jax.random.uniform(keys[1], (4 * H, H), jnp.float32, -k, k)
    b_ih = jax.random.uniform(keys[2], (4 * H,), jnp.float32, -k, k)
    b_hh = jax.random.uniform(keys[3], (4 * H,), jnp.float32, -k, k)
    w1 = jax.random.uniform(keys[4], (F1, H), jnp.float32, -k, k)
    b1 = jax.random.uniform(keys[5], (F1,), jnp.float32, -k, k)
    w2 = jax.random.uniform(keys[6], (NC, F1), jnp.float32, -k2, k2)
    b2 = jax.random.uniform(keys[7], (NC,), jnp.float32, -k2, k2)
    return w_ih, w_hh, b_ih, b_hh, w1, b1, w2, b2


if __name__ == "__main__":
    # Small shapes consistent with the module's forward: (batch, seq, input_size)
    B, D, H, F1, NC = 8, 80, 128, 128, 5

    key = jax.random.PRNGKey(0)
    kp, kx1, kx2 = jax.random.split(key, 3)
    params = _make_params(kp, D, H, F1, NC)

    # --- T=8: fully-unrolled time-loop path ---
    T = 8
    x = jax.random.normal(kx1, (B, T, D), jnp.float32)
    ref = jax.block_until_ready(net_iemocap_reference(x, *params))

    out_f32 = jax.block_until_ready(
        net_iemocap_forward(x, *params, matmul_dtype=jnp.float32))
    assert out_f32.shape == (B, NC), out_f32.shape
    assert jnp.allclose(out_f32, ref, rtol=1e-2, atol=1e-2)

    out_bf16 = jax.block_until_ready(net_iemocap_forward(x, *params))
    assert out_bf16.shape == (B, NC), out_bf16.shape
    assert jnp.allclose(out_bf16, ref, rtol=5e-2, atol=5e-2)

    # --- T=48: lax.fori_loop time-loop path (long-sequence regime) ---
    T2 = 48
    x2 = jax.random.normal(kx2, (B, T2, D), jnp.float32)
    ref2 = jax.block_until_ready(net_iemocap_reference(x2, *params))

    out2_f32 = jax.block_until_ready(
        net_iemocap_forward(x2, *params, matmul_dtype=jnp.float32))
    assert jnp.allclose(out2_f32, ref2, rtol=1e-2, atol=1e-2)

    out2_bf16 = jax.block_until_ready(net_iemocap_forward(x2, *params))
    assert jnp.allclose(out2_bf16, ref2, rtol=5e-2, atol=5e-2)

    print("KERNEL_OK")
</pallas_src>

<mosaic_0001>
module attributes {stable_mosaic.version = 11 : i64} {
  func.func @kernel(%arg0: i32, %arg1: memref<8x8x80xf32, #tpu.memory_space<vmem>>, %arg2: memref<80x512xf32, #tpu.memory_space<vmem>>, %arg3: memref<128x512xf32, #tpu.memory_space<vmem>>, %arg4: memref<1x512xf32, #tpu.memory_space<vmem>>, %arg5: memref<128x128xf32, #tpu.memory_space<vmem>>, %arg6: memref<1x128xf32, #tpu.memory_space<vmem>>, %arg7: memref<128x5xf32, #tpu.memory_space<vmem>>, %arg8: memref<1x5xf32, #tpu.memory_space<vmem>>, %arg9: memref<8x5xf32, #tpu.memory_space<vmem>>, %arg10: memref<8x8x512xf32, #tpu.memory_space<vmem>>) attributes {dimension_semantics = [#tpu.dimension_semantics<arbitrary>], iteration_bounds = array<i64: 1>, scalar_prefetch = 0 : i64, scratch_operands = 1 : i64, tpu.core_type = #tpu.core_type<tc>, window_params = [{transform_indices = @transform_0, window_bounds = array<i64: 8, 8, 80>}, {pipeline_mode = #tpu.pipeline_mode<synchronous>, transform_indices = @transform_1, window_bounds = array<i64: 80, 512>}, {pipeline_mode = #tpu.pipeline_mode<synchronous>, transform_indices = @transform_2, window_bounds = array<i64: 128, 512>}, {pipeline_mode = #tpu.pipeline_mode<synchronous>, transform_indices = @transform_3, window_bounds = array<i64: 1, 512>}, {pipeline_mode = #tpu.pipeline_mode<synchronous>, transform_indices = @transform_4, window_bounds = array<i64: 128, 128>}, {pipeline_mode = #tpu.pipeline_mode<synchronous>, transform_indices = @transform_5, window_bounds = array<i64: 1, 128>}, {pipeline_mode = #tpu.pipeline_mode<synchronous>, transform_indices = @transform_6, window_bounds = array<i64: 128, 5>}, {pipeline_mode = #tpu.pipeline_mode<synchronous>, transform_indices = @transform_7, window_bounds = array<i64: 1, 5>}, {transform_indices = @transform_8, window_bounds = array<i64: 8, 5>}]} {
    %c0 = arith.constant 0 : index
    %c0_0 = arith.constant 0 : index
    %c0_1 = arith.constant 0 : index
    %0 = vector.load %arg1[%c0, %c0_0, %c0_1] : memref<8x8x80xf32, #tpu.memory_space<vmem>>, vector<8x8x80xf32>
    %1 = vector.shape_cast %0 : vector<8x8x80xf32> to vector<64x80xf32>
    %c0_2 = arith.constant 0 : index
    %c0_3 = arith.constant 0 : index
    %2 = vector.load %arg2[%c0_2, %c0_3] : memref<80x512xf32, #tpu.memory_space<vmem>>, vector<80x512xf32>
    %cst = arith.constant dense<0.000000e+00> : vector<64x512xf32>
    %3 = tpu.matmul %1, %2, %cst {dimension_numbers = #tpu.dot_dimension_numbers<[1], [0], [0], [1], [0, 0, 1, 1], [], []>} : vector<64x80xf32>, vector<80x512xf32>, vector<64x512xf32> -> vector<64x512xf32>
    %c0_4 = arith.constant 0 : index
    %c0_5 = arith.constant 0 : index
    %4 = vector.load %arg4[%c0_4, %c0_5] : memref<1x512xf32, #tpu.memory_space<vmem>>, vector<1x512xf32>
    %5 = vector.broadcast %4 : vector<1x512xf32> to vector<64x512xf32>
    %6 = arith.addf %3, %5 : vector<64x512xf32>
    %7 = vector.shape_cast %6 : vector<64x512xf32> to vector<8x8x512xf32>
    %c0_6 = arith.constant 0 : index
    %c0_7 = arith.constant 0 : index
    %c0_8 = arith.constant 0 : index
    %8 = vector.load %arg10[%c0_6, %c0_7, %c0_8] : memref<8x8x512xf32, #tpu.memory_space<vmem>>, vector<8x8x512xf32>
    tpu.vector_store %arg10[%c0_6, %c0_7, %c0_8], %7 {strides = array<i32>} : memref<8x8x512xf32, #tpu.memory_space<vmem>>, vector<8x8x512xf32>,
    %c0_9 = arith.constant 0 : index
    %c0_10 = arith.constant 0 : index
    %9 = vector.load %arg3[%c0_9, %c0_10] : memref<128x512xf32, #tpu.memory_space<vmem>>, vector<128x512xf32>
    %cst_11 = arith.constant 0.000000e+00 : f32
    %10 = vector.broadcast %cst_11 : f32 to vector<8x128xf32>
    %cst_12 = arith.constant 0.000000e+00 : f32
    %11 = vector.broadcast %cst_12 : f32 to vector<8x128xf32>
    %c0_13 = arith.constant 0 : index
    %c0_14 = arith.constant 0 : index
    %c0_15 = arith.constant 0 : index
    %12 = vector.load %arg10[%c0_13, %c0_14, %c0_15] : memref<8x8x512xf32, #tpu.memory_space<vmem>>, vector<1x8x512xf32>
    %13 = vector.shape_cast %12 : vector<1x8x512xf32> to vector<8x512xf32>
    %cst_16 = arith.constant dense<0.000000e+00> : vector<8x512xf32>
    %14 = tpu.matmul %10, %9, %cst_16 {dimension_numbers = #tpu.dot_dimension_numbers<[1], [0], [0], [1], [0, 0, 1, 1], [], []>} : vector<8x128xf32>, vector<128x512xf32>, vector<8x512xf32> -> vector<8x512xf32>
    %15 = arith.addf %13, %14 : vector<8x512xf32>
    %16 = vector.extract_strided_slice %15 {offsets = [0, 0], sizes = [8, 128], strides = [1, 1]} : vector<8x512xf32> to vector<8x128xf32>
    %17 = arith.negf %16 : vector<8x128xf32>
    %18 = math.exp %17 : vector<8x128xf32>
    %cst_17 = arith.constant 1.000000e+00 : f32
    %19 = vector.broadcast %cst_17 : f32 to vector<8x128xf32>
    %20 = arith.addf %19, %18 : vector<8x128xf32>
    %21 = arith.divf %19, %20 : vector<8x128xf32>
    %22 = vector.extract_strided_slice %15 {offsets = [0, 128], sizes = [8, 128], strides = [1, 1]} : vector<8x512xf32> to vector<8x128xf32>
    %23 = arith.negf %22 : vector<8x128xf32>
    %24 = math.exp %23 : vector<8x128xf32>
    %cst_18 = arith.constant 1.000000e+00 : f32
    %25 = vector.broadcast %cst_18 : f32 to vector<8x128xf32>
    %26 = arith.addf %25, %24 : vector<8x128xf32>
    %27 = arith.divf %25, %26 : vector<8x128xf32>
    %28 = vector.extract_strided_slice %15 {offsets = [0, 256], sizes = [8, 128], strides = [1, 1]} : vector<8x512xf32> to vector<8x128xf32>
    %29 = math.tanh %28 : vector<8x128xf32>
    %30 = vector.extract_strided_slice %15 {offsets = [0, 384], sizes = [8, 128], strides = [1, 1]} : vector<8x512xf32> to vector<8x128xf32>
    %31 = arith.negf %30 : vector<8x128xf32>
    %32 = math.exp %31 : vector<8x128xf32>
    %cst_19 = arith.constant 1.000000e+00 : f32
    %33 = vector.broadcast %cst_19 : f32 to vector<8x128xf32>
    %34 = arith.addf %33, %32 : vector<8x128xf32>
    %35 = arith.divf %33, %34 : vector<8x128xf32>
    %36 = arith.mulf %27, %11 : vector<8x128xf32>
    %37 = arith.mulf %21, %29 : vector<8x128xf32>
    %38 = arith.addf %36, %37 : vector<8x128xf32>
    %39 = math.tanh %38 : vector<8x128xf32>
    %40 = arith.mulf %35, %39 : vector<8x128xf32>
    %c1 = arith.constant 1 : index
    %c0_20 = arith.constant 0 : index
    %c0_21 = arith.constant 0 : index
    %41 = vector.load %arg10[%c1, %c0_20, %c0_21] : memref<8x8x512xf32, #tpu.memory_space<vmem>>, vector<1x8x512xf32>
    %42 = vector.shape_cast %41 : vector<1x8x512xf32> to vector<8x512xf32>
    %cst_22 = arith.constant dense<0.000000e+00> : vector<8x512xf32>
    %43 = tpu.matmul %40, %9, %cst_22 {dimension_numbers = #tpu.dot_dimension_numbers<[1], [0], [0], [1], [0, 0, 1, 1], [], []>} : vector<8x128xf32>, vector<128x512xf32>, vector<8x512xf32> -> vector<8x512xf32>
    %44 = arith.addf %42, %43 : vector<8x512xf32>
    %45 = vector.extract_strided_slice %44 {offsets = [0, 0], sizes = [8, 128], strides = [1, 1]} : vector<8x512xf32> to vector<8x128xf32>
    %46 = arith.negf %45 : vector<8x128xf32>
    %47 = math.exp %46 : vector<8x128xf32>
    %cst_23 = arith.constant 1.000000e+00 : f32
    %48 = vector.broadcast %cst_23 : f32 to vector<8x128xf32>
    %49 = arith.addf %48, %47 : vector<8x128xf32>
    %50 = arith.divf %48, %49 : vector<8x128xf32>
    %51 = vector.extract_strided_slice %44 {offsets = [0, 128], sizes = [8, 128], strides = [1, 1]} : vector<8x512xf32> to vector<8x128xf32>
    %52 = arith.negf %51 : vector<8x128xf32>
    %53 = math.exp %52 : vector<8x128xf32>
    %cst_24 = arith.constant 1.000000e+00 : f32
    %54 = vector.broadcast %cst_24 : f32 to vector<8x128xf32>
    %55 = arith.addf %54, %53 : vector<8x128xf32>
    %56 = arith.divf %54, %55 : vector<8x128xf32>
    %57 = vector.extract_strided_slice %44 {offsets = [0, 256], sizes = [8, 128], strides = [1, 1]} : vector<8x512xf32> to vector<8x128xf32>
    %58 = math.tanh %57 : vector<8x128xf32>
    %59 = vector.extract_strided_slice %44 {offsets = [0, 384], sizes = [8, 128], strides = [1, 1]} : vector<8x512xf32> to vector<8x128xf32>
    %60 = arith.negf %59 : vector<8x128xf32>
    %61 = math.exp %60 : vector<8x128xf32>
    %cst_25 = arith.constant 1.000000e+00 : f32
    %62 = vector.broadcast %cst_25 : f32 to vector<8x128xf32>
    %63 = arith.addf %62, %61 : vector<8x128xf32>
    %64 = arith.divf %62, %63 : vector<8x128xf32>
    %65 = arith.mulf %56, %38 : vector<8x128xf32>
    %66 = arith.mulf %50, %58 : vector<8x128xf32>
    %67 = arith.addf %65, %66 : vector<8x128xf32>
    %68 = math.tanh %67 : vector<8x128xf32>
    %69 = arith.mulf %64, %68 : vector<8x128xf32>
    %c2 = arith.constant 2 : index
    %c0_26 = arith.constant 0 : index
    %c0_27 = arith.constant 0 : index
    %70 = vector.load %arg10[%c2, %c0_26, %c0_27] : memref<8x8x512xf32, #tpu.memory_space<vmem>>, vector<1x8x512xf32>
    %71 = vector.shape_cast %70 : vector<1x8x512xf32> to vector<8x512xf32>
    %cst_28 = arith.constant dense<0.000000e+00> : vector<8x512xf32>
    %72 = tpu.matmul %69, %9, %cst_28 {dimension_numbers = #tpu.dot_dimension_numbers<[1], [0], [0], [1], [0, 0, 1, 1], [], []>} : vector<8x128xf32>, vector<128x512xf32>, vector<8x512xf32> -> vector<8x512xf32>
    %73 = arith.addf %71, %72 : vector<8x512xf32>
    %74 = vector.extract_strided_slice %73 {offsets = [0, 0], sizes = [8, 128], strides = [1, 1]} : vector<8x512xf32> to vector<8x128xf32>
    %75 = arith.negf %74 : vector<8x128xf32>
    %76 = math.exp %75 : vector<8x128xf32>
    %cst_29 = arith.constant 1.000000e+00 : f32
    %77 = vector.broadcast %cst_29 : f32 to vector<8x128xf32>
    %78 = arith.addf %77, %76 : vector<8x128xf32>
    %79 = arith.divf %77, %78 : vector<8x128xf32>
    %80 = vector.extract_strided_slice %73 {offsets = [0, 128], sizes = [8, 128], strides = [1, 1]} : vector<8x512xf32> to vector<8x128xf32>
    %81 = arith.negf %80 : vector<8x128xf32>
    %82 = math.exp %81 : vector<8x128xf32>
    %cst_30 = arith.constant 1.000000e+00 : f32
    %83 = vector.broadcast %cst_30 : f32 to vector<8x128xf32>
    %84 = arith.addf %83, %82 : vector<8x128xf32>
    %85 = arith.divf %83, %84 : vector<8x128xf32>
    %86 = vector.extract_strided_slice %73 {offsets = [0, 256], sizes = [8, 128], strides = [1, 1]} : vector<8x512xf32> to vector<8x128xf32>
    %87 = math.tanh %86 : vector<8x128xf32>
    %88 = vector.extract_strided_slice %73 {offsets = [0, 384], sizes = [8, 128], strides = [1, 1]} : vector<8x512xf32> to vector<8x128xf32>
    %89 = arith.negf %88 : vector<8x128xf32>
    %90 = math.exp %89 : vector<8x128xf32>
    %cst_31 = arith.constant 1.000000e+00 : f32
    %91 = vector.broadcast %cst_31 : f32 to vector<8x128xf32>
    %92 = arith.addf %91, %90 : vector<8x128xf32>
    %93 = arith.divf %91, %92 : vector<8x128xf32>
    %94 = arith.mulf %85, %67 : vector<8x128xf32>
    %95 = arith.mulf %79, %87 : vector<8x128xf32>
    %96 = arith.addf %94, %95 : vector<8x128xf32>
    %97 = math.tanh %96 : vector<8x128xf32>
    %98 = arith.mulf %93, %97 : vector<8x128xf32>
    %c3 = arith.constant 3 : index
    %c0_32 = arith.constant 0 : index
    %c0_33 = arith.constant 0 : index
    %99 = vector.load %arg10[%c3, %c0_32, %c0_33] : memref<8x8x512xf32, #tpu.memory_space<vmem>>, vector<1x8x512xf32>
    %100 = vector.shape_cast %99 : vector<1x8x512xf32> to vector<8x512xf32>
    %cst_34 = arith.constant dense<0.000000e+00> : vector<8x512xf32>
    %101 = tpu.matmul %98, %9, %cst_34 {dimension_numbers = #tpu.dot_dimension_numbers<[1], [0], [0], [1], [0, 0, 1, 1], [], []>} : vector<8x128xf32>, vector<128x512xf32>, vector<8x512xf32> -> vector<8x512xf32>
    %102 = arith.addf %100, %101 : vector<8x512xf32>
    %103 = vector.extract_strided_slice %102 {offsets = [0, 0], sizes = [8, 128], strides = [1, 1]} : vector<8x512xf32> to vector<8x128xf32>
    %104 = arith.negf %103 : vector<8x128xf32>
    %105 = math.exp %104 : vector<8x128xf32>
    %cst_35 = arith.constant 1.000000e+00 : f32
    %106 = vector.broadcast %cst_35 : f32 to vector<8x128xf32>
    %107 = arith.addf %106, %105 : vector<8x128xf32>
    %108 = arith.divf %106, %107 : vector<8x128xf32>
    %109 = vector.extract_strided_slice %102 {offsets = [0, 128], sizes = [8, 128], strides = [1, 1]} : vector<8x512xf32> to vector<8x128xf32>
    %110 = arith.negf %109 : vector<8x128xf32>
    %111 = math.exp %110 : vector<8x128xf32>
    %cst_36 = arith.constant 1.000000e+00 : f32
    %112 = vector.broadcast %cst_36 : f32 to vector<8x128xf32>
    %113 = arith.addf %112, %111 : vector<8x128xf32>
    %114 = arith.divf %112, %113 : vector<8x128xf32>
    %115 = vector.extract_strided_slice %102 {offsets = [0, 256], sizes = [8, 128], strides = [1, 1]} : vector<8x512xf32> to vector<8x128xf32>
    %116 = math.tanh %115 : vector<8x128xf32>
    %117 = vector.extract_strided_slice %102 {offsets = [0, 384], sizes = [8, 128], strides = [1, 1]} : vector<8x512xf32> to vector<8x128xf32>
    %118 = arith.negf %117 : vector<8x128xf32>
    %119 = math.exp %118 : vector<8x128xf32>
    %cst_37 = arith.constant 1.000000e+00 : f32
    %120 = vector.broadcast %cst_37 : f32 to vector<8x128xf32>
    %121 = arith.addf %120, %119 : vector<8x128xf32>
    %122 = arith.divf %120, %121 : vector<8x128xf32>
    %123 = arith.mulf %114, %96 : vector<8x128xf32>
    %124 = arith.mulf %108, %116 : vector<8x128xf32>
    %125 = arith.addf %123, %124 : vector<8x128xf32>
    %126 = math.tanh %125 : vector<8x128xf32>
    %127 = arith.mulf %122, %126 : vector<8x128xf32>
    %c4 = arith.constant 4 : index
    %c0_38 = arith.constant 0 : index
    %c0_39 = arith.constant 0 : index
    %128 = vector.load %arg10[%c4, %c0_38, %c0_39] : memref<8x8x512xf32, #tpu.memory_space<vmem>>, vector<1x8x512xf32>
    %129 = vector.shape_cast %128 : vector<1x8x512xf32> to vector<8x512xf32>
    %cst_40 = arith.constant dense<0.000000e+00> : vector<8x512xf32>
    %130 = tpu.matmul %127, %9, %cst_40 {dimension_numbers = #tpu.dot_dimension_numbers<[1], [0], [0], [1], [0, 0, 1, 1], [], []>} : vector<8x128xf32>, vector<128x512xf32>, vector<8x512xf32> -> vector<8x512xf32>
    %131 = arith.addf %129, %130 : vector<8x512xf32>
    %132 = vector.extract_strided_slice %131 {offsets = [0, 0], sizes = [8, 128], strides = [1, 1]} : vector<8x512xf32> to vector<8x128xf32>
    %133 = arith.negf %132 : vector<8x128xf32>
    %134 = math.exp %133 : vector<8x128xf32>
    %cst_41 = arith.constant 1.000000e+00 : f32
    %135 = vector.broadcast %cst_41 : f32 to vector<8x128xf32>
    %136 = arith.addf %135, %134 : vector<8x128xf32>
    %137 = arith.divf %135, %136 : vector<8x128xf32>
    %138 = vector.extract_strided_slice %131 {offsets = [0, 128], sizes = [8, 128], strides = [1, 1]} : vector<8x512xf32> to vector<8x128xf32>
    %139 = arith.negf %138 : vector<8x128xf32>
    %140 = math.exp %139 : vector<8x128xf32>
    %cst_42 = arith.constant 1.000000e+00 : f32
    %141 = vector.broadcast %cst_42 : f32 to vector<8x128xf32>
    %142 = arith.addf %141, %140 : vector<8x128xf32>
    %143 = arith.divf %141, %142 : vector<8x128xf32>
    %144 = vector.extract_strided_slice %131 {offsets = [0, 256], sizes = [8, 128], strides = [1, 1]} : vector<8x512xf32> to vector<8x128xf32>
    %145 = math.tanh %144 : vector<8x128xf32>
    %146 = vector.extract_strided_slice %131 {offsets = [0, 384], sizes = [8, 128], strides = [1, 1]} : vector<8x512xf32> to vector<8x128xf32>
    %147 = arith.negf %146 : vector<8x128xf32>
    %148 = math.exp %147 : vector<8x128xf32>
    %cst_43 = arith.constant 1.000000e+00 : f32
    %149 = vector.broadcast %cst_43 : f32 to vector<8x128xf32>
    %150 = arith.addf %149, %148 : vector<8x128xf32>
    %151 = arith.divf %149, %150 : vector<8x128xf32>
    %152 = arith.mulf %143, %125 : vector<8x128xf32>
    %153 = arith.mulf %137, %145 : vector<8x128xf32>
    %154 = arith.addf %152, %153 : vector<8x128xf32>
    %155 = math.tanh %154 : vector<8x128xf32>
    %156 = arith.mulf %151, %155 : vector<8x128xf32>
    %c5 = arith.constant 5 : index
    %c0_44 = arith.constant 0 : index
    %c0_45 = arith.constant 0 : index
    %157 = vector.load %arg10[%c5, %c0_44, %c0_45] : memref<8x8x512xf32, #tpu.memory_space<vmem>>, vector<1x8x512xf32>
    %158 = vector.shape_cast %157 : vector<1x8x512xf32> to vector<8x512xf32>
    %cst_46 = arith.constant dense<0.000000e+00> : vector<8x512xf32>
    %159 = tpu.matmul %156, %9, %cst_46 {dimension_numbers = #tpu.dot_dimension_numbers<[1], [0], [0], [1], [0, 0, 1, 1], [], []>} : vector<8x128xf32>, vector<128x512xf32>, vector<8x512xf32> -> vector<8x512xf32>
    %160 = arith.addf %158, %159 : vector<8x512xf32>
    %161 = vector.extract_strided_slice %160 {offsets = [0, 0], sizes = [8, 128], strides = [1, 1]} : vector<8x512xf32> to vector<8x128xf32>
    %162 = arith.negf %161 : vector<8x128xf32>
    %163 = math.exp %162 : vector<8x128xf32>
    %cst_47 = arith.constant 1.000000e+00 : f32
    %164 = vector.broadcast %cst_47 : f32 to vector<8x128xf32>
    %165 = arith.addf %164, %163 : vector<8x128xf32>
    %166 = arith.divf %164, %165 : vector<8x128xf32>
    %167 = vector.extract_strided_slice %160 {offsets = [0, 128], sizes = [8, 128], strides = [1, 1]} : vector<8x512xf32> to vector<8x128xf32>
    %168 = arith.negf %167 : vector<8x128xf32>
    %169 = math.exp %168 : vector<8x128xf32>
    %cst_48 = arith.constant 1.000000e+00 : f32
    %170 = vector.broadcast %cst_48 : f32 to vector<8x128xf32>
    %171 = arith.addf %170, %169 : vector<8x128xf32>
    %172 = arith.divf %170, %171 : vector<8x128xf32>
    %173 = vector.extract_strided_slice %160 {offsets = [0, 256], sizes = [8, 128], strides = [1, 1]} : vector<8x512xf32> to vector<8x128xf32>
    %174 = math.tanh %173 : vector<8x128xf32>
    %175 = vector.extract_strided_slice %160 {offsets = [0, 384], sizes = [8, 128], strides = [1, 1]} : vector<8x512xf32> to vector<8x128xf32>
    %176 = arith.negf %175 : vector<8x128xf32>
    %177 = math.exp %176 : vector<8x128xf32>
    %cst_49 = arith.constant 1.000000e+00 : f32
    %178 = vector.broadcast %cst_49 : f32 to vector<8x128xf32>
    %179 = arith.addf %178, %177 : vector<8x128xf32>
    %180 = arith.divf %178, %179 : vector<8x128xf32>
    %181 = arith.mulf %172, %154 : vector<8x128xf32>
    %182 = arith.mulf %166, %174 : vector<8x128xf32>
    %183 = arith.addf %181, %182 : vector<8x128xf32>
    %184 = math.tanh %183 : vector<8x128xf32>
    %185 = arith.mulf %180, %184 : vector<8x128xf32>
    %c6 = arith.constant 6 : index
    %c0_50 = arith.constant 0 : index
    %c0_51 = arith.constant 0 : index
    %186 = vector.load %arg10[%c6, %c0_50, %c0_51] : memref<8x8x512xf32, #tpu.memory_space<vmem>>, vector<1x8x512xf32>
    %187 = vector.shape_cast %186 : vector<1x8x512xf32> to vector<8x512xf32>
    %cst_52 = arith.constant dense<0.000000e+00> : vector<8x512xf32>
    %188 = tpu.matmul %185, %9, %cst_52 {dimension_numbers = #tpu.dot_dimension_numbers<[1], [0], [0], [1], [0, 0, 1, 1], [], []>} : vector<8x128xf32>, vector<128x512xf32>, vector<8x512xf32> -> vector<8x512xf32>
    %189 = arith.addf %187, %188 : vector<8x512xf32>
    %190 = vector.extract_strided_slice %189 {offsets = [0, 0], sizes = [8, 128], strides = [1, 1]} : vector<8x512xf32> to vector<8x128xf32>
    %191 = arith.negf %190 : vector<8x128xf32>
    %192 = math.exp %191 : vector<8x128xf32>
    %cst_53 = arith.constant 1.000000e+00 : f32
    %193 = vector.broadcast %cst_53 : f32 to vector<8x128xf32>
    %194 = arith.addf %193, %192 : vector<8x128xf32>
    %195 = arith.divf %193, %194 : vector<8x128xf32>
    %196 = vector.extract_strided_slice %189 {offsets = [0, 128], sizes = [8, 128], strides = [1, 1]} : vector<8x512xf32> to vector<8x128xf32>
    %197 = arith.negf %196 : vector<8x128xf32>
    %198 = math.exp %197 : vector<8x128xf32>
    %cst_54 = arith.constant 1.000000e+00 : f32
    %199 = vector.broadcast %cst_54 : f32 to vector<8x128xf32>
    %200 = arith.addf %199, %198 : vector<8x128xf32>
    %201 = arith.divf %199, %200 : vector<8x128xf32>
    %202 = vector.extract_strided_slice %189 {offsets = [0, 256], sizes = [8, 128], strides = [1, 1]} : vector<8x512xf32> to vector<8x128xf32>
    %203 = math.tanh %202 : vector<8x128xf32>
    %204 = vector.extract_strided_slice %189 {offsets = [0, 384], sizes = [8, 128], strides = [1, 1]} : vector<8x512xf32> to vector<8x128xf32>
    %205 = arith.negf %204 : vector<8x128xf32>
    %206 = math.exp %205 : vector<8x128xf32>
    %cst_55 = arith.constant 1.000000e+00 : f32
    %207 = vector.broadcast %cst_55 : f32 to vector<8x128xf32>
    %208 = arith.addf %207, %206 : vector<8x128xf32>
    %209 = arith.divf %207, %208 : vector<8x128xf32>
    %210 = arith.mulf %201, %183 : vector<8x128xf32>
    %211 = arith.mulf %195, %203 : vector<8x128xf32>
    %212 = arith.addf %210, %211 : vector<8x128xf32>
    %213 = math.tanh %212 : vector<8x128xf32>
    %214 = arith.mulf %209, %213 : vector<8x128xf32>
    %c7 = arith.constant 7 : index
    %c0_56 = arith.constant 0 : index
    %c0_57 = arith.constant 0 : index
    %215 = vector.load %arg10[%c7, %c0_56, %c0_57] : memref<8x8x512xf32, #tpu.memory_space<vmem>>, vector<1x8x512xf32>
    %216 = vector.shape_cast %215 : vector<1x8x512xf32> to vector<8x512xf32>
    %cst_58 = arith.constant dense<0.000000e+00> : vector<8x512xf32>
    %217 = tpu.matmul %214, %9, %cst_58 {dimension_numbers = #tpu.dot_dimension_numbers<[1], [0], [0], [1], [0, 0, 1, 1], [], []>} : vector<8x128xf32>, vector<128x512xf32>, vector<8x512xf32> -> vector<8x512xf32>
    %218 = arith.addf %216, %217 : vector<8x512xf32>
    %219 = vector.extract_strided_slice %218 {offsets = [0, 0], sizes = [8, 128], strides = [1, 1]} : vector<8x512xf32> to vector<8x128xf32>
    %220 = arith.negf %219 : vector<8x128xf32>
    %221 = math.exp %220 : vector<8x128xf32>
    %cst_59 = arith.constant 1.000000e+00 : f32
    %222 = vector.broadcast %cst_59 : f32 to vector<8x128xf32>
    %223 = arith.addf %222, %221 : vector<8x128xf32>
    %224 = arith.divf %222, %223 : vector<8x128xf32>
    %225 = vector.extract_strided_slice %218 {offsets = [0, 128], sizes = [8, 128], strides = [1, 1]} : vector<8x512xf32> to vector<8x128xf32>
    %226 = arith.negf %225 : vector<8x128xf32>
    %227 = math.exp %226 : vector<8x128xf32>
    %cst_60 = arith.constant 1.000000e+00 : f32
    %228 = vector.broadcast %cst_60 : f32 to vector<8x128xf32>
    %229 = arith.addf %228, %227 : vector<8x128xf32>
    %230 = arith.divf %228, %229 : vector<8x128xf32>
    %231 = vector.extract_strided_slice %218 {offsets = [0, 256], sizes = [8, 128], strides = [1, 1]} : vector<8x512xf32> to vector<8x128xf32>
    %232 = math.tanh %231 : vector<8x128xf32>
    %233 = vector.extract_strided_slice %218 {offsets = [0, 384], sizes = [8, 128], strides = [1, 1]} : vector<8x512xf32> to vector<8x128xf32>
    %234 = arith.negf %233 : vector<8x128xf32>
    %235 = math.exp %234 : vector<8x128xf32>
    %cst_61 = arith.constant 1.000000e+00 : f32
    %236 = vector.broadcast %cst_61 : f32 to vector<8x128xf32>
    %237 = arith.addf %236, %235 : vector<8x128xf32>
    %238 = arith.divf %236, %237 : vector<8x128xf32>
    %239 = arith.mulf %230, %212 : vector<8x128xf32>
    %240 = arith.mulf %224, %232 : vector<8x128xf32>
    %241 = arith.addf %239, %240 : vector<8x128xf32>
    %242 = math.tanh %241 : vector<8x128xf32>
    %243 = arith.mulf %238, %242 : vector<8x128xf32>
    %cst_62 = arith.constant 0.000000e+00 : f32
    %244 = vector.broadcast %cst_62 : f32 to vector<8x128xf32>
    %245 = arith.maximumf %243, %244 : vector<8x128xf32>
    %c0_63 = arith.constant 0 : index
    %c0_64 = arith.constant 0 : index
    %246 = vector.load %arg5[%c0_63, %c0_64] : memref<128x128xf32, #tpu.memory_space<vmem>>, vector<128x128xf32>
    %cst_65 = arith.constant dense<0.000000e+00> : vector<8x128xf32>
    %247 = tpu.matmul %245, %246, %cst_65 {dimension_numbers = #tpu.dot_dimension_numbers<[1], [0], [0], [1], [0, 0, 1, 1], [], []>} : vector<8x128xf32>, vector<128x128xf32>, vector<8x128xf32> -> vector<8x128xf32>
    %c0_66 = arith.constant 0 : index
    %c0_67 = arith.constant 0 : index
    %248 = vector.load %arg6[%c0_66, %c0_67] : memref<1x128xf32, #tpu.memory_space<vmem>>, vector<1x128xf32>
    %249 = vector.broadcast %248 : vector<1x128xf32> to vector<8x128xf32>
    %250 = arith.addf %247, %249 : vector<8x128xf32>
    %cst_68 = arith.constant 0.000000e+00 : f32
    %251 = vector.broadcast %cst_68 : f32 to vector<8x128xf32>
    %252 = arith.maximumf %250, %251 : vector<8x128xf32>
    %c0_69 = arith.constant 0 : index
    %c0_70 = arith.constant 0 : index
    %253 = vector.load %arg7[%c0_69, %c0_70] : memref<128x5xf32, #tpu.memory_space<vmem>>, vector<128x5xf32>
    %cst_71 = arith.constant dense<0.000000e+00> : vector<8x5xf32>
    %254 = tpu.matmul %252, %253, %cst_71 {dimension_numbers = #tpu.dot_dimension_numbers<[1], [0], [0], [1], [0, 0, 1, 1], [], []>} : vector<8x128xf32>, vector<128x5xf32>, vector<8x5xf32> -> vector<8x5xf32>
    %c0_72 = arith.constant 0 : index
    %c0_73 = arith.constant 0 : index
    %255 = vector.load %arg8[%c0_72, %c0_73] : memref<1x5xf32, #tpu.memory_space<vmem>>, vector<1x5xf32>
    %256 = vector.broadcast %255 : vector<1x5xf32> to vector<8x5xf32>
    %257 = arith.addf %254, %256 : vector<8x5xf32>
    %c0_74 = arith.constant 0 : index
    %c0_75 = arith.constant 0 : index
    %258 = vector.load %arg9[%c0_74, %c0_75] : memref<8x5xf32, #tpu.memory_space<vmem>>, vector<8x5xf32>
    tpu.vector_store %arg9[%c0_74, %c0_75], %257 {strides = array<i32>} : memref<8x5xf32, #tpu.memory_space<vmem>>, vector<8x5xf32>,
    return
  }
  func.func @transform_0(%arg0: i32) -> (i32, i32, i32) {
    %c0_i32 = arith.constant 0 : i32
    %c0_i32_0 = arith.constant 0 : i32
    %c0_i32_1 = arith.constant 0 : i32
    return %c0_i32, %arg0, %c0_i32_0 : i32, i32, i32
  }
  func.func @transform_1(%arg0: i32) -> (i32, i32) {
    %c0_i32 = arith.constant 0 : i32
    %c0_i32_0 = arith.constant 0 : i32
    %c0_i32_1 = arith.constant 0 : i32
    return %c0_i32, %c0_i32_0 : i32, i32
  }
  func.func @transform_2(%arg0: i32) -> (i32, i32) {
    %c0_i32 = arith.constant 0 : i32
    %c0_i32_0 = arith.constant 0 : i32
    %c0_i32_1 = arith.constant 0 : i32
    return %c0_i32, %c0_i32_0 : i32, i32
  }
  func.func @transform_3(%arg0: i32) -> (i32, i32) {
    %c0_i32 = arith.constant 0 : i32
    %c0_i32_0 = arith.constant 0 : i32
    %c0_i32_1 = arith.constant 0 : i32
    return %c0_i32, %c0_i32_0 : i32, i32
  }
  func.func @transform_4(%arg0: i32) -> (i32, i32) {
    %c0_i32 = arith.constant 0 : i32
    %c0_i32_0 = arith.constant 0 : i32
    %c0_i32_1 = arith.constant 0 : i32
    return %c0_i32, %c0_i32_0 : i32, i32
  }
  func.func @transform_5(%arg0: i32) -> (i32, i32) {
    %c0_i32 = arith.constant 0 : i32
    %c0_i32_0 = arith.constant 0 : i32
    %c0_i32_1 = arith.constant 0 : i32
    return %c0_i32, %c0_i32_0 : i32, i32
  }
  func.func @transform_6(%arg0: i32) -> (i32, i32) {
    %c0_i32 = arith.constant 0 : i32
    %c0_i32_0 = arith.constant 0 : i32
    %c0_i32_1 = arith.constant 0 : i32
    return %c0_i32, %c0_i32_0 : i32, i32
  }
  func.func @transform_7(%arg0: i32) -> (i32, i32) {
    %c0_i32 = arith.constant 0 : i32
    %c0_i32_0 = arith.constant 0 : i32
    %c0_i32_1 = arith.constant 0 : i32
    return %c0_i32, %c0_i32_0 : i32, i32
  }
  func.func @transform_8(%arg0: i32) -> (i32, i32) {
    %c0_i32 = arith.constant 0 : i32
    %c0_i32_0 = arith.constant 0 : i32
    return %arg0, %c0_i32 : i32, i32
  }
}

</mosaic_0001>

<bundles_post_ra>
// kernel: tpu_custom_call.1
= control target key start
LH: loop header
LB: loop body
LE: loop exit
PB: predicated region body
PF: predicated region fallthrough
CT: control target
= control target key end

     0   :  { %13 = vsyncpa [#allocation4], 0  ;;  %s3807_s0 = inlined_call_operand.hbm [shape: f32[8,8,80], index: 0, kind: input, shape index: {}]   ;;  %s3808_s1 = inlined_call_operand.hbm [shape: f32[80,512], index: 1, kind: input, shape index: {}]   ;;  %s3809_s2 = inlined_call_operand.hbm [shape: f32[128,512], index: 2, kind: input, shape index: {}]   ;;  %s3810_s3 = inlined_call_operand.vmem [shape: f32[1,512], index: 3, kind: input, shape index: {}]   ;;  %s3811_s4 = inlined_call_operand.vmem [shape: f32[128,128], index: 4, kind: input, shape index: {}]   ;;  %s3812_s5 = inlined_call_operand.vmem [shape: f32[1,128], index: 5, kind: input, shape index: {}]   ;;  %s3813_s6 = inlined_call_operand.vmem [shape: f32[128,5], index: 6, kind: input, shape index: {}]   ;;  %s3814_s7 = inlined_call_operand.vmem [shape: f32[1,5], index: 7, kind: input, shape index: {}]   ;;  %s3815_s8 = inlined_call_operand.hbm [shape: f32[8,5], index: 8, kind: output, shape index: {}]  }
   0x1   :  { %14 = vsyncpa [#allocation7], 0 }
   0x2   :  { %15 = vsyncpa [#allocation5], 0  ;;  %s3136_s27 = smov [#allocation6]   ;;  %s3042_s9 = scalar_lea.hbm %s3808_s1, 5120 }
   0x3   :  { %s33_s28 = sshll.u32 %s3136_s27, 4  ;;  %p3043_p0 = scmp.ne.s32.totalorder %s3808_s1, %s3042_s9  ;;  %s34_s28 = int_to_ptr.vmem [resolvable:$true] %s33_s28 }
   0x4   :  { %p3046_p1 = scmp.lt.u32.totalorder %s3042_s9, %s3808_s1 }
   0x6   :  { %p3048_p2 = pnand %p3046_p1, %p3043_p0 }
   0x8   :  { %3051 = shalt.err (!%p3048_p2)
}
   0x9   :  { %s3052_s14 = scalar_lea.vmem %s34_s28, 5120  ;;  %p3057_p4 = scmp.lt.s32.totalorder %s34_s28, %s34_s28 }
   0xa   :  { %p3053_p3 = scmp.ne.s32.totalorder %s34_s28, %s3052_s14  ;;  %p3058_p5 = scmp.lt.s32.totalorder %s3052_s14, %s3052_s14 }
   0xc   :  { %p3059_p6 = por %p3058_p5, %p3057_p4 }
   0xe   :  { %p3060_p7 = pnand %p3059_p6, %p3053_p3 }
  0x10   :  { %3063 = shalt.err (!%p3060_p7)
}
  0x11   :  { %s3137_s15 = smov 512   ;;  %s3138_s16 = smov 32  }
  0x12   :  { %39 = dma.hbm_to_vmem [thread:$0]  %s3808_s1, 5120, %s34_s28, [#allocation7], %s3137_s15, %s3137_s15, %s3138_s16  }
  0x13   :  { %s3139_s19 = smov [#allocation3]   ;;  %s3064_s23 = scalar_lea.hbm %s3807_s0, 1024 }
  0x14   :  { %s21_s20 = sshll.u32 %s3139_s19, 4  ;;  %p3065_p8 = scmp.ne.s32.totalorder %s3807_s0, %s3064_s23  ;;  %s22_s20 = int_to_ptr.vmem [resolvable:$true] %s21_s20 }
  0x15   :  { %p3068_p9 = scmp.lt.u32.totalorder %s3064_s23, %s3807_s0 }
  0x17   :  { %p3070_p10 = pnand %p3068_p9, %p3065_p8 }
  0x19   :  { %3073 = shalt.err (!%p3070_p10)
}
  0x1a   :  { %s3074_s29 = scalar_lea.vmem %s22_s20, 1024  ;;  %p3079_p12 = scmp.lt.s32.totalorder %s22_s20, %s22_s20 }
  0x1b   :  { %p3075_p11 = scmp.ne.s32.totalorder %s22_s20, %s3074_s29  ;;  %p3080_p13 = scmp.lt.s32.totalorder %s3074_s29, %s3074_s29 }
  0x1d   :  { %p3081_p0 = por %p3080_p13, %p3079_p12 }
  0x1f   :  { %p3082_p1 = pnand %p3081_p0, %p3075_p11 }
  0x21   :  { %3085 = shalt.err (!%p3082_p1)
}
  0x22   :  { %s3140_s1 = smov 128   ;;  %s3141_s28 = smov 8  }
  0x23   :  { %27 = dma.hbm_to_vmem [thread:$0]  %s3807_s0, 1024, %s22_s20, [#allocation4], %s3140_s1, %s3140_s1, %s3141_s28  }
  0x24   :  { %s3142_s10 = smov [#allocation8]   ;;  %s3086_s14 = scalar_lea.hbm %s3809_s2, 8192 }
  0x25   :  { %s45_s11 = sshll.u32 %s3142_s10, 4  ;;  %p3087_p2 = scmp.ne.s32.totalorder %s3809_s2, %s3086_s14  ;;  %s46_s11 = int_to_ptr.vmem [resolvable:$true] %s45_s11 }
  0x26   :  { %p3090_p3 = scmp.lt.u32.totalorder %s3086_s14, %s3809_s2 }
  0x28   :  { %p3092_p4 = pnand %p3090_p3, %p3087_p2 }
  0x2a   :  { %3095 = shalt.err (!%p3092_p4)
}
  0x2b   :  { %s3096_s22 = scalar_lea.vmem %s46_s11, 8192  ;;  %p3101_p6 = scmp.lt.s32.totalorder %s46_s11, %s46_s11 }
  0x2c   :  { %p3097_p5 = scmp.ne.s32.totalorder %s46_s11, %s3096_s22  ;;  %p3102_p7 = scmp.lt.s32.totalorder %s3096_s22, %s3096_s22 }
  0x2e   :  { %p3103_p8 = por %p3102_p7, %p3101_p6 }
  0x30   :  { %p3104_p9 = pnand %p3103_p8, %p3097_p5 }
  0x32   :  { %3107 = shalt.err (!%p3104_p9)
}
  0x33   :  { %51 = dma.hbm_to_vmem [thread:$0]  %s3809_s2, 8192, %s46_s11, [#allocation7], %s3137_s15, %s3137_s15, %s3138_s16  }
  0x34   :  { %3130 = dma.done.wait [#allocation4], 1024  }
  0x35   :  { %3131 = vsyncadd [#allocation4], 4294966272 }
  0x36   :  { %3132 = dma.done.wait [#allocation7], 13312  }
  0x37   :  { %3133 = vsyncadd [#allocation7], 4294953984  ;;  %v3143_v0 = vmov 0.0   ;;  %v80_v1 = vld [vmem:[#allocation6 + $0x8] sm:$0xff]  ;;  %v82_v3 = vld [vmem:[#allocation6 + $0x18] sm:$0xff]  ;;  %vm141_vm0 = vcmask 654336  }
  0x38   :  { %230 = vmatprep.mubr.f32.mxu0 %v3143_v0  ;;  %343 = vmatprep.mubr.f32.mxu1 %v3143_v0  ;;  %v84_v2 = vld [vmem:[#allocation6 + $0x28] sm:$0xff]  ;;  %v86_v5 = vld [vmem:[#allocation6 + $0x38] sm:$0xff]  ;;  %v79_v6 = vld [vmem:[#allocation6] sm:$0xff]  ;;  %vm3145_vm1 = vmmov 0   ;;  %s3146_s12 = smov [#allocation9]   ;;  %vm2075_vm2 = vcmask 39936  }
  0x39   :  { %v2239_v4 = vpack.c.bf16 %v84_v2, %v80_v1  ;;  %v83_v7 = vld [vmem:[#allocation6 + $0x20] sm:$0xff]  ;;  %v2259_v8 = vpack.c.bf16 %v86_v5, %v82_v3  ;;  %v81_v10 = vld [vmem:[#allocation6 + $0x10] sm:$0xff]  ;;  %v88_v12 = vld [vmem:[#allocation6 + $0x48] sm:$0xff]  ;;  %s2083_s13 = sshll.u32 %s3146_s12, 4  ;;  %s2084_s13 = int_to_ptr.vmem [resolvable:$true] %s2083_s13 }
  0x3a   :  { %v2241_v9 = vpack.c.bf16 %v83_v7, %v79_v6  ;;  %v85_v11 = vld [vmem:[#allocation6 + $0x30] sm:$0xff]  ;;  %v92_v14 = vld [vmem:[#allocation6 + $0x68] sm:$0xff]  ;;  %v90_v15 = vld [vmem:[#allocation6 + $0x58] sm:$0xff]  ;;  %p3113_p11 = scmp.lt.s32.totalorder %s2084_s13, %s2084_s13 }
  0x3b   :  { %2240 = vmatprep.subr.bf16.mxu0 %v2239_v4  ;;  %v2261_v13 = vpack.c.bf16 %v85_v11, %v81_v10  ;;  %v94_v16 = vld [vmem:[#allocation6 + $0x78] sm:$0xff]  ;;  %2260 = vmatprep.subr.bf16.mxu1 %v2259_v8  ;;  %v2243_v17 = vpack.c.bf16 %v92_v14, %v88_v12  ;;  %v87_v19 = vld [vmem:[#allocation6 + $0x40] sm:$0xff]  ;;  %v89_v21 = vld [vmem:[#allocation6 + $0x50] sm:$0xff] }
  0x3c   :  { %2242 = vmatpush1.bf16.msra.mxu0 %v2241_v9  ;;  %v2263_v18 = vpack.c.bf16 %v94_v16, %v90_v15  ;;  %v91_v20 = vld [vmem:[#allocation6 + $0x60] sm:$0xff]  ;;  %v93_v23 = vld [vmem:[#allocation6 + $0x70] sm:$0xff]  ;;  %v96_v24 = vld [vmem:[#allocation6 + $0x88] sm:$0xff] }
  0x3d   :  { %2262 = vmatpush1.bf16.msra.mxu1 %v2261_v13  ;;  %v2245_v22 = vpack.c.bf16 %v91_v20, %v87_v19  ;;  %v100_v25 = vld [vmem:[#allocation6 + $0xa8] sm:$0xff]  ;;  %2244 = vmatprep.subr.bf16.mxu0 %v2243_v17  ;;  %v2265_v26 = vpack.c.bf16 %v93_v23, %v89_v21  ;;  %v98_v28 = vld [vmem:[#allocation6 + $0x98] sm:$0xff]  ;;  %v95_v30 = vld [vmem:[#allocation6 + $0x80] sm:$0xff] }
  0x3e   :  { %2264 = vmatprep.subr.bf16.mxu1 %v2263_v18  ;;  %v2247_v27 = vpack.c.bf16 %v100_v25, %v96_v24  ;;  %v102_v29 = vld [vmem:[#allocation6 + $0xb8] sm:$0xff]  ;;  %v99_v32 = vld [vmem:[#allocation6 + $0xa0] sm:$0xff]  ;;  %v97_v33 = vld [vmem:[#allocation6 + $0x90] sm:$0xff] }
  0x3f   :  { %v2267_v31 = vpack.c.bf16 %v102_v29, %v98_v28  ;;  %v101_v34 = vld [vmem:[#allocation6 + $0xb0] sm:$0xff]  ;;  %v2249_v35 = vpack.c.bf16 %v99_v32, %v95_v30  ;;  %v104_v36 = vld [vmem:[#allocation6 + $0xc8] sm:$0xff]  ;;  %v106_v38 = vld [vmem:[#allocation6 + $0xd8] sm:$0xff] }
  0x40   :  { %2246 = vmatpush1.bf16.msra.mxu0 %v2245_v22  ;;  %v108_v37 = vld [vmem:[#allocation6 + $0xe8] sm:$0xff]  ;;  %v2269_v39 = vpack.c.bf16 %v101_v34, %v97_v33  ;;  %v110_v41 = vld [vmem:[#allocation6 + $0xf8] sm:$0xff]  ;;  %v103_v42 = vld [vmem:[#allocation6 + $0xc0] sm:$0xff] }
  0x41   :  { %2266 = vmatpush1.bf16.msra.mxu1 %v2265_v26  ;;  %2248 = vmatprep.subr.bf16.mxu0 %v2247_v27  ;;  %v2251_v40 = vpack.c.bf16 %v108_v37, %v104_v36  ;;  %v107_v43 = vld [vmem:[#allocation6 + $0xe0] sm:$0xff]  ;;  %v2271_v44 = vpack.c.bf16 %v110_v41, %v106_v38  ;;  %v105_v45 = vld [vmem:[#allocation6 + $0xd0] sm:$0xff]  ;;  %v112_v47 = vld [vmem:[#allocation6 + $0x108] sm:$0xff] }
  0x42   :  { %2268 = vmatprep.subr.bf16.mxu1 %v2267_v31  ;;  %v109_v46 = vld [vmem:[#allocation6 + $0xf0] sm:$0xff]  ;;  %v116_v48 = vld [vmem:[#allocation6 + $0x128] sm:$0xff]  ;;  %v114_v49 = vld [vmem:[#allocation6 + $0x118] sm:$0xff]  ;;  %v2253_v51 = vpack.c.bf16 %v107_v43, %v103_v42 }
  0x43   :  { %v118_v50 = vld [vmem:[#allocation6 + $0x138] sm:$0xff]  ;;  %v2273_v52 = vpack.c.bf16 %v109_v46, %v105_v45  ;;  %v2255_v53 = vpack.c.bf16 %v116_v48, %v112_v47  ;;  %v111_v54 = vld [vmem:[#allocation6 + $0x100] sm:$0xff]  ;;  %v113_v56 = vld [vmem:[#allocation6 + $0x110] sm:$0xff] }
  0x44   :  { %2250 = vmatpush1.bf16.msra.mxu0 %v2249_v35  ;;  %v115_v55 = vld [vmem:[#allocation6 + $0x120] sm:$0xff]  ;;  %v2275_v57 = vpack.c.bf16 %v118_v50, %v114_v49  ;;  %v117_v58 = vld [vmem:[#allocation6 + $0x130] sm:$0xff]  ;;  %v425_v59 = vld [vmem:[#allocation8 + $0x8] sm:$0xff] }
  0x45   :  { %2270 = vmatpush1.bf16.msra.mxu1 %v2269_v39  ;;  %2252 = vmatprep.subr.bf16.mxu0 %v2251_v40  ;;  %v429_v60 = vld [vmem:[#allocation8 + $0x28] sm:$0xff]  ;;  %v427_v61 = vld [vmem:[#allocation8 + $0x18] sm:$0xff]  ;;  %v2257_v63 = vpack.c.bf16 %v115_v55, %v111_v54  ;;  %v2277_v1 = vpack.c.bf16 %v117_v58, %v113_v56  ;;  %v424_v3 = vld [vmem:[#allocation8] sm:$0xff] }
  0x46   :  { %2272 = vmatprep.subr.bf16.mxu1 %v2271_v44  ;;  %v431_v62 = vld [vmem:[#allocation8 + $0x38] sm:$0xff]  ;;  %v3236_v2 = vpack.c.bf16 %v429_v60, %v425_v59  ;;  %v428_v4 = vld [vmem:[#allocation8 + $0x20] sm:$0xff]  ;;  %v426_v6 = vld [vmem:[#allocation8 + $0x10] sm:$0xff] }
  0x47   :  { %v3238_v5 = vpack.c.bf16 %v431_v62, %v427_v61  ;;  %v430_v7 = vld [vmem:[#allocation8 + $0x30] sm:$0xff]  ;;  %v433_v8 = vld [vmem:[#allocation8 + $0x48] sm:$0xff]  ;;  %v71_v10 = vld [vmem:[#allocation3] sm:$0xff]  ;;  %v3240_v11 = vpack.c.bf16 %v428_v4, %v424_v3 }
  0x48   :  { %2254 = vmatpush1.bf16.msra.mxu0 %v2253_v51  ;;  %v437_v9 = vld [vmem:[#allocation8 + $0x68] sm:$0xff]  ;;  %v435_v12 = vld [vmem:[#allocation8 + $0x58] sm:$0xff]  ;;  %v3243_v14 = vpack.c.bf16 %v430_v7, %v426_v6  ;;  %v432_v15 = vld [vmem:[#allocation8 + $0x40] sm:$0xff] }
  0x49   :  { %2274 = vmatpush1.bf16.msra.mxu1 %v2273_v52  ;;  %2256 = vmatprep.subr.bf16.mxu0 %v2255_v53  ;;  %v439_v13 = vld [vmem:[#allocation8 + $0x78] sm:$0xff]  ;;  %v436_v16 = vld [vmem:[#allocation8 + $0x60] sm:$0xff]  ;;  %v3246_v17 = vpack.c.bf16 %v437_v9, %v433_v8  ;;  %v434_v18 = vld [vmem:[#allocation8 + $0x50] sm:$0xff] }
  0x4a   :  { %2276 = vmatprep.subr.bf16.mxu1 %v2275_v57  ;;  %v438_v19 = vld [vmem:[#allocation8 + $0x70] sm:$0xff]  ;;  %v3249_v20 = vpack.c.bf16 %v439_v13, %v435_v12  ;;  %v441_v21 = vld [vmem:[#allocation8 + $0x88] sm:$0xff]  ;;  %v3253_v24 = vpack.c.bf16 %v436_v16, %v432_v15  ;;  %v443_v25 = vld [vmem:[#allocation8 + $0x98] sm:$0xff] }
  0x4b   :  { %v445_v22 = vld [vmem:[#allocation8 + $0xa8] sm:$0xff]  ;;  %v447_v26 = vld [vmem:[#allocation8 + $0xb8] sm:$0xff]  ;;  %v3257_v27 = vpack.c.bf16 %v438_v19, %v434_v18  ;;  %v440_v28 = vld [vmem:[#allocation8 + $0x80] sm:$0xff] }
  0x4c   :  { %2258 = vmatpush1.bf16.msra.mxu0 %v2257_v63  ;;  %v72_v23 = vld [vmem:[#allocation3 + $0x8] sm:$0xff]  ;;  %v444_v29 = vld [vmem:[#allocation8 + $0xa0] sm:$0xff]  ;;  %v3261_v30 = vpack.c.bf16 %v445_v22, %v441_v21  ;;  %v442_v31 = vld [vmem:[#allocation8 + $0x90] sm:$0xff]  ;;  %v3265_v33 = vpack.c.bf16 %v447_v26, %v443_v25 }
  0x4d   :  { %2278 = vmatpush1.bf16.msra.mxu1 %v2277_v1  ;;  %2280 = vmatprep.subr.bf16.mxu0 %v3236_v2  ;;  %v446_v32 = vld [vmem:[#allocation8 + $0xb0] sm:$0xff]  ;;  %v449_v34 = vld [vmem:[#allocation8 + $0xc8] sm:$0xff]  ;;  %v3269_v37 = vpack.c.bf16 %v444_v29, %v440_v28  ;;  %v451_v38 = vld [vmem:[#allocation8 + $0xd8] sm:$0xff] }
  0x4e   :  { %2312 = vmatprep.subr.bf16.mxu1 %v3238_v5  ;;  %v453_v35 = vld [vmem:[#allocation8 + $0xe8] sm:$0xff]  ;;  %v73_v36 = vld [vmem:[#allocation3 + $0x10] sm:$0xff]  ;;  %v455_v39 = vld [vmem:[#allocation8 + $0xf8] sm:$0xff]  ;;  %v3273_v40 = vpack.c.bf16 %v446_v32, %v442_v31 }
  0x4f   :  { %2093 = vmatmul.mubr.msk.f32.vlgmr.msra.gmra.mrb[0].mxu0 %vm141_vm0, %v71_v10  ;;  %v448_v41 = vld [vmem:[#allocation8 + $0xc0] sm:$0xff]  ;;  %v3277_v43 = vpack.c.bf16 %v453_v35, %v449_v34  ;;  %v450_v44 = vld [vmem:[#allocation8 + $0xd0] sm:$0xff]  ;;  %v3281_v46 = vpack.c.bf16 %v455_v39, %v451_v38  ;;  %v457_v47 = vld [vmem:[#allocation8 + $0x108] sm:$0xff] }
  0x50   :  { %2101 = vmatmul.mubr.msk.f32.vlgmr.msra.gmra.mrb[0].mxu1 %vm141_vm0, %v71_v10  ;;  %2282 = vmatpush1.bf16.msra.mxu0 %v3240_v11  ;;  %v452_v42 = vld [vmem:[#allocation8 + $0xe0] sm:$0xff]  ;;  %v454_v45 = vld [vmem:[#allocation8 + $0xf0] sm:$0xff]  ;;  %v461_v48 = vld [vmem:[#allocation8 + $0x128] sm:$0xff] }
  0x51   :  { %2314 = vmatpush1.bf16.msra.mxu1 %v3243_v14  ;;  %236 = vmatprep.mubr.f32.mxu0 %v3143_v0  ;;  %v74_v49 = vld [vmem:[#allocation3 + $0x18] sm:$0xff]  ;;  %v3285_v50 = vpack.c.bf16 %v452_v42, %v448_v41  ;;  %v3289_v53 = vpack.c.bf16 %v454_v45, %v450_v44  ;;  %v456_v54 = vld [vmem:[#allocation8 + $0x100] sm:$0xff]  ;;  %v3293_v56 = vpack.c.bf16 %v461_v48, %v457_v47  ;;  %v458_v57 = vld [vmem:[#allocation8 + $0x110] sm:$0xff] }
  0x52   :  { %349 = vmatprep.mubr.f32.mxu1 %v3143_v0  ;;  %2284 = vmatprep.subr.bf16.mxu0 %v3246_v17  ;;  %v459_v51 = vld [vmem:[#allocation8 + $0x118] sm:$0xff]  ;;  %v460_v55 = vld [vmem:[#allocation8 + $0x120] sm:$0xff]  ;;  %v462_v58 = vld [vmem:[#allocation8 + $0x130] sm:$0xff] }
  0x53   :  { %2094 = vmatmul.mubr.msk.f32.gmra.mrb[2].mxu0 %vm141_vm0, %v72_v23  ;;  %2316 = vmatprep.subr.bf16.mxu1 %v3249_v20  ;;  %v463_v52 = vld [vmem:[#allocation8 + $0x138] sm:$0xff]  ;;  %v465_v60 = vld [vmem:[#allocation8 + $0x148] sm:$0xff]  ;;  %v75_v62 = vld [vmem:[#allocation3 + $0x20] sm:$0xff]  ;;  %v3301_v63 = vpack.c.bf16 %v460_v55, %v456_v54  ;;  %v3305_v4 = vpack.c.bf16 %v462_v58, %v458_v57  ;;  %v121_v55 = vlaneseq }
  0x54   :  { %2102 = vmatmul.mubr.msk.f32.gmra.mrb[2].mxu1 %vm141_vm0, %v72_v23  ;;  %2286 = vmatpush1.bf16.msra.mxu0 %v3253_v24  ;;  %v3297_v59 = vpack.c.bf16 %v463_v52, %v459_v51  ;;  %v469_v61 = vld [vmem:[#allocation8 + $0x168] sm:$0xff]  ;;  %v467_v1 = vld [vmem:[#allocation8 + $0x158] sm:$0xff]  ;;  %v464_v6 = vld [vmem:[#allocation8 + $0x140] sm:$0xff] }
  0x55   :  { %2318 = vmatpush1.bf16.msra.mxu1 %v3257_v27  ;;  %242 = vmatprep.mubr.f32.mxu0 %v3143_v0  ;;  %v471_v3 = vld [vmem:[#allocation8 + $0x178] sm:$0xff]  ;;  %v468_v7 = vld [vmem:[#allocation8 + $0x160] sm:$0xff]  ;;  %v3309_v8 = vpack.c.bf16 %v469_v61, %v465_v60  ;;  %v466_v9 = vld [vmem:[#allocation8 + $0x150] sm:$0xff]  ;;  %v122_v57 = vshrl.u32 %v121_v55, 7 }
  0x56   :  { %355 = vmatprep.mubr.f32.mxu1 %v3143_v0  ;;  %2288 = vmatprep.subr.bf16.mxu0 %v3261_v30  ;;  %v470_v10 = vld [vmem:[#allocation8 + $0x170] sm:$0xff]  ;;  %v3313_v12 = vpack.c.bf16 %v471_v3, %v467_v1  ;;  %v473_v13 = vld [vmem:[#allocation8 + $0x188] sm:$0xff]  ;;  %v3317_v18 = vpack.c.bf16 %v468_v7, %v464_v6  ;;  %v475_v19 = vld [vmem:[#allocation8 + $0x198] sm:$0xff] }
  0x57   :  { %2095 = vmatmul.mubr.msk.f32.gmra.mrb[4].mxu0 %vm141_vm0, %v73_v36  ;;  %2320 = vmatprep.subr.bf16.mxu1 %v3265_v33  ;;  %v477_v15 = vld [vmem:[#allocation8 + $0x1a8] sm:$0xff]  ;;  %v479_v21 = vld [vmem:[#allocation8 + $0x1b8] sm:$0xff]  ;;  %v3321_v22 = vpack.c.bf16 %v470_v10, %v466_v9  ;;  %v472_v23 = vld [vmem:[#allocation8 + $0x180] sm:$0xff]  ;;  %v123_v58 = vsub.s32 0, %v122_v57  ;;  %v127_v61 = vsub.s32 1, %v122_v57  ;;  %v135_v6 = vsub.s32 3, %v122_v57 }
  0x58   :  { %2103 = vmatmul.mubr.msk.f32.gmra.mrb[4].mxu1 %vm141_vm0, %v73_v36  ;;  %2290 = vmatpush1.bf16.msra.mxu0 %v3269_v37  ;;  %v76_v16 = vld [vmem:[#allocation3 + $0x28] sm:$0xff]  ;;  %v476_v25 = vld [vmem:[#allocation8 + $0x1a0] sm:$0xff]  ;;  %v3325_v26 = vpack.c.bf16 %v477_v15, %v473_v13  ;;  %v474_v28 = vld [vmem:[#allocation8 + $0x190] sm:$0xff]  ;;  %v3329_v31 = vpack.c.bf16 %v479_v21, %v475_v19 }
  0x59   :  { %2322 = vmatpush1.bf16.msra.mxu1 %v3273_v40  ;;  %248 = vmatprep.mubr.f32.mxu0 %v3143_v0  ;;  %v478_v29 = vld [vmem:[#allocation8 + $0x1b0] sm:$0xff]  ;;  %v481_v32 = vld [vmem:[#allocation8 + $0x1c8] sm:$0xff]  ;;  %v3333_v36 = vpack.c.bf16 %v476_v25, %v472_v23  ;;  %v483_v38 = vld [vmem:[#allocation8 + $0x1d8] sm:$0xff]  ;;  %v131_v23 = vsub.s32 2, %v122_v57 }
  0x5a   :  { %361 = vmatprep.mubr.f32.mxu1 %v3143_v0  ;;  %2292 = vmatprep.subr.bf16.mxu0 %v3277_v43  ;;  %v485_v34 = vld [vmem:[#allocation8 + $0x1e8] sm:$0xff]  ;;  %v77_v35 = vld [vmem:[#allocation3 + $0x30] sm:$0xff]  ;;  %v487_v39 = vld [vmem:[#allocation8 + $0x1f8] sm:$0xff]  ;;  %v3337_v41 = vpack.c.bf16 %v478_v29, %v474_v28 }
  0x5b   :  { %2096 = vmatmul.mubr.msk.f32.gmra.mrb[6].mxu0 %vm141_vm0, %v74_v49  ;;  %2324 = vmatprep.subr.bf16.mxu1 %v3281_v46  ;;  %v480_v42 = vld [vmem:[#allocation8 + $0x1c0] sm:$0xff]  ;;  %v3341_v45 = vpack.c.bf16 %v485_v34, %v481_v32  ;;  %v482_v47 = vld [vmem:[#allocation8 + $0x1d0] sm:$0xff]  ;;  %v78_v51 = vld [vmem:[#allocation3 + $0x38] sm:$0xff] }
  0x5c   :  { %2104 = vmatmul.mubr.msk.f32.gmra.mrb[6].mxu1 %vm141_vm0, %v74_v49  ;;  %2294 = vmatpush1.bf16.msra.mxu0 %v3285_v50  ;;  %v484_v44 = vld [vmem:[#allocation8 + $0x1e0] sm:$0xff]  ;;  %v486_v48 = vld [vmem:[#allocation8 + $0x1f0] sm:$0xff]  ;;  %v3345_v49 = vpack.c.bf16 %v487_v39, %v483_v38 }
  0x5d   :  { %2326 = vmatpush1.bf16.msra.mxu1 %v3289_v53  ;;  %254 = vmatprep.mubr.f32.mxu0 %v3143_v0  ;;  %v3349_v52 = vpack.c.bf16 %v484_v44, %v480_v42  ;;  %v3353_v54 = vpack.c.bf16 %v486_v48, %v482_v47  ;;  %v119_v60 = vld [vmem:[%s3810_s3] sm:$0xf] }
  0x5e   :  { %367 = vmatprep.mubr.f32.mxu1 %v3143_v0  ;;  %2296 = vmatprep.subr.bf16.mxu0 %v3293_v56  ;;  %v3407_v1 = vrot.slane %v119_v60, %v127_v61  ;;  %v3411_v21 = vrot.slane %v119_v60, %v135_v6  ;;  %v3414_v28 = vrot.slane %v119_v60, %v131_v23 }
  0x5f   :  { %2097 = vmatmul.mubr.msk.f32.gmra.mrb[8].mxu0 %vm141_vm0, %v75_v62  ;;  %2328 = vmatprep.subr.bf16.mxu1 %v3297_v59 }
  0x60   :  { %2105 = vmatmul.mubr.msk.f32.gmra.mrb[8].mxu1 %vm141_vm0, %v75_v62  ;;  %2298 = vmatpush1.bf16.msra.mxu0 %v3301_v63  ;;  %v3405_v62 = vrot.slane %v119_v60, %v123_v58 }
  0x61   :  { %2330 = vmatpush1.bf16.msra.mxu1 %v3305_v4  ;;  %260 = vmatprep.mubr.f32.mxu0 %v3143_v0 }
  0x62   :  { %373 = vmatprep.mubr.f32.mxu1 %v3143_v0  ;;  %2300 = vmatprep.subr.bf16.mxu0 %v3309_v8 }
  0x63   :  { %2098 = vmatmul.mubr.msk.f32.gmra.mrb[10].mxu0 %vm141_vm0, %v76_v16  ;;  %2332 = vmatprep.subr.bf16.mxu1 %v3313_v12 }
  0x64   :  { %2106 = vmatmul.mubr.msk.f32.gmra.mrb[10].mxu1 %vm141_vm0, %v76_v16  ;;  %2302 = vmatpush1.bf16.msra.mxu0 %v3317_v18 }
  0x65   :  { %2334 = vmatpush1.bf16.msra.mxu1 %v3321_v22  ;;  %266 = vmatprep.mubr.f32.mxu0 %v3143_v0 }
  0x66   :  { %379 = vmatprep.mubr.f32.mxu1 %v3143_v0  ;;  %2304 = vmatprep.subr.bf16.mxu0 %v3325_v26 }
  0x67   :  { %2099 = vmatmul.mubr.msk.f32.gmra.mrb[12].mxu0 %vm141_vm0, %v77_v35  ;;  %2336 = vmatprep.subr.bf16.mxu1 %v3329_v31 }
  0x68   :  { %2107 = vmatmul.mubr.msk.f32.gmra.mrb[12].mxu1 %vm141_vm0, %v77_v35  ;;  %2306 = vmatpush1.bf16.msra.mxu0 %v3333_v36 }
  0x69   :  { %2338 = vmatpush1.bf16.msra.mxu1 %v3337_v41  ;;  %272 = vmatprep.mubr.f32.mxu0 %v3143_v0 }
  0x6a   :  { %385 = vmatprep.mubr.f32.mxu1 %v3143_v0  ;;  %2308 = vmatprep.subr.bf16.mxu0 %v3341_v45 }
  0x6b   :  { %2100 = vmatmul.mubr.msk.f32.gmra.mrb[14].mxu0 %vm141_vm0, %v78_v51  ;;  %2340 = vmatprep.subr.bf16.mxu1 %v3345_v49 }
  0x6c   :  { %2108 = vmatmul.mubr.msk.f32.gmra.mrb[14].mxu1 %vm141_vm0, %v78_v51  ;;  %2310 = vmatpush1.bf16.msra.mxu0 %v3349_v52 }
  0x6d   :  { %2342 = vmatpush1.bf16.msra.mxu1 %v3353_v54  ;;  %556 = vmatprep.mubr.f32.mxu0 %v3143_v0 }
  0x6e   :  { %627 = vmatprep.mubr.f32.mxu1 %v3143_v0  ;;  %2344 = vmatprep.subr.bf16.mxu0 %v3236_v2 }
  0x6f   :  { %557 = vmatmul.mubr.f32.vlgmr.msra.gmra.mrb[0].mxu0 %v3143_v0  ;;  %2376 = vmatprep.subr.bf16.mxu1 %v3238_v5 }
  0x70   :  { %628 = vmatmul.mubr.f32.vlgmr.msra.gmra.mrb[0].mxu1 %v3143_v0  ;;  %2346 = vmatpush1.bf16.msra.mxu0 %v3240_v11 }
  0x71   :  { %2378 = vmatpush1.bf16.msra.mxu1 %v3243_v14  ;;  %2348 = vmatprep.subr.bf16.mxu0 %v3246_v17 }
  0x72   :  { %2380 = vmatprep.subr.bf16.mxu1 %v3249_v20  ;;  %731 = vmatprep.mubr.f32.mxu0 %v3143_v0 }
  0x73   :  { %802 = vmatprep.mubr.f32.mxu1 %v3143_v0 }
  0x74   :  { %2350 = vmatpush1.bf16.msra.mxu0 %v3253_v24 }
  0x75   :  { %2382 = vmatpush1.bf16.msra.mxu1 %v3257_v27  ;;  %2352 = vmatprep.subr.bf16.mxu0 %v3261_v30 }
  0x76   :  { %2384 = vmatprep.subr.bf16.mxu1 %v3265_v33 }
  0x78   :  { %2354 = vmatpush1.bf16.msra.mxu0 %v3269_v37 }
  0x79   :  { %2386 = vmatpush1.bf16.msra.mxu1 %v3273_v40  ;;  %2356 = vmatprep.subr.bf16.mxu0 %v3277_v43 }
  0x7a   :  { %2388 = vmatprep.subr.bf16.mxu1 %v3281_v46 }
  0x7c   :  { %2358 = vmatpush1.bf16.msra.mxu0 %v3285_v50 }
  0x7d   :  { %2390 = vmatpush1.bf16.msra.mxu1 %v3289_v53  ;;  %2360 = vmatprep.subr.bf16.mxu0 %v3293_v56 }
  0x7e   :  { %2392 = vmatprep.subr.bf16.mxu1 %v3297_v59 }
  0x80   :  { %2362 = vmatpush1.bf16.msra.mxu0 %v3301_v63 }
  0x81   :  { %2394 = vmatpush1.bf16.msra.mxu1 %v3305_v4  ;;  %2364 = vmatprep.subr.bf16.mxu0 %v3309_v8 }
  0x82   :  { %2396 = vmatprep.subr.bf16.mxu1 %v3313_v12 }
  0x84   :  { %2366 = vmatpush1.bf16.msra.mxu0 %v3317_v18 }
  0x85   :  { %2398 = vmatpush1.bf16.msra.mxu1 %v3321_v22  ;;  %2368 = vmatprep.subr.bf16.mxu0 %v3325_v26 }
  0x86   :  { %2400 = vmatprep.subr.bf16.mxu1 %v3329_v31 }
  0x88   :  { %2370 = vmatpush1.bf16.msra.mxu0 %v3333_v36 }
  0x89   :  { %2402 = vmatpush1.bf16.msra.mxu1 %v3337_v41  ;;  %2372 = vmatprep.subr.bf16.mxu0 %v3341_v45 }
  0x8a   :  { %2404 = vmatprep.subr.bf16.mxu1 %v3345_v49 }
  0x8c   :  { %2374 = vmatpush1.bf16.msra.mxu0 %v3349_v52 }
  0x8d   :  { %2406 = vmatpush1.bf16.msra.mxu1 %v3353_v54  ;;  %2408 = vmatprep.subr.bf16.mxu0 %v3236_v2 }
  0x8e   :  { %2440 = vmatprep.subr.bf16.mxu1 %v3238_v5 }
 0x142   :  { %v558_v3 = vpop.f32.mrb[0].mxu0 }
 0x143   :  { %v2839_v7 = vadd.f32 %v558_v3, %v3405_v62  ;;  %v629_v9 = vpop.f32.mrb[0].mxu1  ;;  %v560_v10 = vpop.f32.mrb[1].mxu0 }
 0x144   :  { %v2840_v13 = vadd.f32 %v560_v10, %v3407_v1  ;;  %v631_v15 = vpop.f32.mrb[1].mxu1  ;;  %v2855_v32 = vadd.f32 %v629_v9, %v3414_v28 }
 0x145   :  { %v2109_v16 = vmul.f32 -1.442695, %v2839_v7  ;;  %v2856_v25 = vadd.f32 %v631_v15, %v3411_v21 }
 0x146   :  { %v2110_v19 = vmul.f32 -1.442695, %v2840_v13 }
 0x147   :  { %2914 = vpow2.f32 %v2109_v16  ;;  %v2111_v29 = vmul.f32 -1.442695, %v2856_v25 }
 0x148   :  { %2916 = vpow2.f32 %v2110_v19 }
 0x149   :  { %2918 = vpow2.f32 %v2111_v29 }
 0x14a   :  { %2920 = vtanh.f32 %v2855_v32 }
 0x151   :  { %v2915_v34 = vpop.eup %2914 }
 0x152   :  { %v2917_v35 = vpop.eup %2916  ;;  %v641_v38 = vadd.f32 1.0, %v2915_v34 }
 0x153   :  { %v647_v39 = vadd.f32 1.0, %v2917_v35  ;;  %v2919_v42 = vpop.eup %2918 }
 0x154   :  { %2922 = vrcp.f32 %v641_v38  ;;  %v2921_v44 = vpop.eup %2920  ;;  %v654_v55 = vadd.f32 1.0, %v2919_v42 }
 0x155   :  { %2924 = vrcp.f32 %v647_v39 }
 0x156   :  { %2926 = vrcp.f32 %v654_v55 }
 0x15e   :  { %v2923_v47 = vpop.eup %2922 }
 0x15f   :  { %v2925_v48 = vpop.eup %2924  ;;  %v658_v51 = vmul.f32 %v2923_v47, %v2921_v44 }
 0x160   :  { %v657_v57 = vmul.f32 0.0, %v2925_v48  ;;  %v2927_v60 = vpop.eup %2926 }
 0x162   :  { %v3417_v58 = vadd.f32 %v658_v51, %v657_v57 }
 0x164   :  { %2928 = vtanh.f32 %v3417_v58 }
 0x16e   :  { %v2929_v61 = vpop.eup %2928 }
 0x16f   :  { %v661_v3 = vmul.f32 %v2929_v61, %v2927_v60 }
 0x171   :  { %732 = vmatmul.mubr.f32.vlgmr.msra.gmra.mrb[2].mxu0 %v661_v3  ;;  %803 = vmatmul.mubr.f32.vlgmr.msra.gmra.mrb[2].mxu1 %v661_v3 }
 0x172   :  { %2410 = vmatpush1.bf16.msra.mxu0 %v3240_v11  ;;  %2442 = vmatpush1.bf16.msra.mxu1 %v3243_v14 }
 0x173   :  { %2412 = vmatprep.subr.bf16.mxu0 %v3246_v17  ;;  %2444 = vmatprep.subr.bf16.mxu1 %v3249_v20 }
 0x174   :  { %906 = vmatprep.mubr.f32.mxu0 %v3143_v0  ;;  %977 = vmatprep.mubr.f32.mxu1 %v3143_v0 }
 0x176   :  { %2414 = vmatpush1.bf16.msra.mxu0 %v3253_v24  ;;  %2446 = vmatpush1.bf16.msra.mxu1 %v3257_v27 }
 0x177   :  { %2416 = vmatprep.subr.bf16.mxu0 %v3261_v30  ;;  %2448 = vmatprep.subr.bf16.mxu1 %v3265_v33 }
 0x17a   :  { %2418 = vmatpush1.bf16.msra.mxu0 %v3269_v37  ;;  %2450 = vmatpush1.bf16.msra.mxu1 %v3273_v40 }
 0x17b   :  { %2420 = vmatprep.subr.bf16.mxu0 %v3277_v43  ;;  %2452 = vmatprep.subr.bf16.mxu1 %v3281_v46 }
 0x17e   :  { %2422 = vmatpush1.bf16.msra.mxu0 %v3285_v50  ;;  %2454 = vmatpush1.bf16.msra.mxu1 %v3289_v53 }
 0x17f   :  { %2424 = vmatprep.subr.bf16.mxu0 %v3293_v56  ;;  %2456 = vmatprep.subr.bf16.mxu1 %v3297_v59 }
 0x182   :  { %2426 = vmatpush1.bf16.msra.mxu0 %v3301_v63  ;;  %2458 = vmatpush1.bf16.msra.mxu1 %v3305_v4 }
 0x183   :  { %2428 = vmatprep.subr.bf16.mxu0 %v3309_v8  ;;  %2460 = vmatprep.subr.bf16.mxu1 %v3313_v12 }
 0x186   :  { %2430 = vmatpush1.bf16.msra.mxu0 %v3317_v18  ;;  %2462 = vmatpush1.bf16.msra.mxu1 %v3321_v22 }
 0x187   :  { %2432 = vmatprep.subr.bf16.mxu0 %v3325_v26  ;;  %2464 = vmatprep.subr.bf16.mxu1 %v3329_v31 }
 0x18a   :  { %2434 = vmatpush1.bf16.msra.mxu0 %v3333_v36  ;;  %2466 = vmatpush1.bf16.msra.mxu1 %v3337_v41 }
 0x18b   :  { %2436 = vmatprep.subr.bf16.mxu0 %v3341_v45  ;;  %2468 = vmatprep.subr.bf16.mxu1 %v3345_v49 }
 0x18e   :  { %2438 = vmatpush1.bf16.msra.mxu0 %v3349_v52  ;;  %2470 = vmatpush1.bf16.msra.mxu1 %v3353_v54 }
 0x18f   :  { %2472 = vmatprep.subr.bf16.mxu0 %v3236_v2  ;;  %2504 = vmatprep.subr.bf16.mxu1 %v3238_v5 }
 0x244   :  { %v733_v6 = vpop.f32.mrb[2].mxu0  ;;  %v804_v7 = vpop.f32.mrb[2].mxu1 }
 0x245   :  { %v2841_v9 = vadd.f32 %v733_v6, %v3405_v62  ;;  %v735_v10 = vpop.f32.mrb[3].mxu0  ;;  %v806_v13 = vpop.f32.mrb[3].mxu1  ;;  %v2857_v29 = vadd.f32 %v804_v7, %v3414_v28 }
 0x246   :  { %v2842_v15 = vadd.f32 %v735_v10, %v3407_v1  ;;  %v2858_v23 = vadd.f32 %v806_v13, %v3411_v21 }
 0x247   :  { %v2112_v16 = vmul.f32 -1.442695, %v2841_v9 }
 0x248   :  { %v2113_v19 = vmul.f32 -1.442695, %v2842_v15  ;;  %v2114_v25 = vmul.f32 -1.442695, %v2858_v23 }
 0x249   :  { %2930 = vpow2.f32 %v2112_v16 }
 0x24a   :  { %2932 = vpow2.f32 %v2113_v19 }
 0x24b   :  { %2934 = vpow2.f32 %v2114_v25 }
 0x24c   :  { %2936 = vtanh.f32 %v2857_v29 }
 0x253   :  { %v2931_v32 = vpop.eup %2930 }
 0x254   :  { %v2933_v34 = vpop.eup %2932  ;;  %v816_v35 = vadd.f32 1.0, %v2931_v32 }
 0x255   :  { %v822_v38 = vadd.f32 1.0, %v2933_v34  ;;  %v2935_v39 = vpop.eup %2934 }
 0x256   :  { %2938 = vrcp.f32 %v816_v35  ;;  %v2937_v42 = vpop.eup %2936  ;;  %v829_v51 = vadd.f32 1.0, %v2935_v39 }
 0x257   :  { %2940 = vrcp.f32 %v822_v38 }
 0x258   :  { %2942 = vrcp.f32 %v829_v51 }
 0x260   :  { %v2939_v44 = vpop.eup %2938 }
 0x261   :  { %v2941_v47 = vpop.eup %2940  ;;  %v833_v48 = vmul.f32 %v2939_v44, %v2937_v42 }
 0x262   :  { %v832_v55 = vmul.f32 %v2941_v47, %v3417_v58  ;;  %v2943_v60 = vpop.eup %2942 }
 0x264   :  { %v3459_v57 = vadd.f32 %v833_v48, %v832_v55 }
 0x266   :  { %2944 = vtanh.f32 %v3459_v57 }
 0x270   :  { %v2945_v61 = vpop.eup %2944 }
 0x271   :  { %v836_v3 = vmul.f32 %v2945_v61, %v2943_v60 }
 0x273   :  { %907 = vmatmul.mubr.f32.vlgmr.msra.gmra.mrb[4].mxu0 %v836_v3  ;;  %978 = vmatmul.mubr.f32.vlgmr.msra.gmra.mrb[4].mxu1 %v836_v3 }
 0x274   :  { %2474 = vmatpush1.bf16.msra.mxu0 %v3240_v11  ;;  %2506 = vmatpush1.bf16.msra.mxu1 %v3243_v14 }
 0x275   :  { %2476 = vmatprep.subr.bf16.mxu0 %v3246_v17  ;;  %2508 = vmatprep.subr.bf16.mxu1 %v3249_v20 }
 0x276   :  { %1081 = vmatprep.mubr.f32.mxu0 %v3143_v0  ;;  %1152 = vmatprep.mubr.f32.mxu1 %v3143_v0 }
 0x278   :  { %2478 = vmatpush1.bf16.msra.mxu0 %v3253_v24  ;;  %2510 = vmatpush1.bf16.msra.mxu1 %v3257_v27 }
 0x279   :  { %2480 = vmatprep.subr.bf16.mxu0 %v3261_v30  ;;  %2512 = vmatprep.subr.bf16.mxu1 %v3265_v33 }
 0x27c   :  { %2482 = vmatpush1.bf16.msra.mxu0 %v3269_v37  ;;  %2514 = vmatpush1.bf16.msra.mxu1 %v3273_v40 }
 0x27d   :  { %2484 = vmatprep.subr.bf16.mxu0 %v3277_v43  ;;  %2516 = vmatprep.subr.bf16.mxu1 %v3281_v46 }
 0x280   :  { %2486 = vmatpush1.bf16.msra.mxu0 %v3285_v50  ;;  %2518 = vmatpush1.bf16.msra.mxu1 %v3289_v53 }
 0x281   :  { %2488 = vmatprep.subr.bf16.mxu0 %v3293_v56  ;;  %2520 = vmatprep.subr.bf16.mxu1 %v3297_v59 }
 0x284   :  { %2490 = vmatpush1.bf16.msra.mxu0 %v3301_v63  ;;  %2522 = vmatpush1.bf16.msra.mxu1 %v3305_v4 }
 0x285   :  { %2492 = vmatprep.subr.bf16.mxu0 %v3309_v8  ;;  %2524 = vmatprep.subr.bf16.mxu1 %v3313_v12 }
 0x288   :  { %2494 = vmatpush1.bf16.msra.mxu0 %v3317_v18  ;;  %2526 = vmatpush1.bf16.msra.mxu1 %v3321_v22 }
 0x289   :  { %2496 = vmatprep.subr.bf16.mxu0 %v3325_v26  ;;  %2528 = vmatprep.subr.bf16.mxu1 %v3329_v31 }
 0x28c   :  { %2498 = vmatpush1.bf16.msra.mxu0 %v3333_v36  ;;  %2530 = vmatpush1.bf16.msra.mxu1 %v3337_v41 }
 0x28d   :  { %2500 = vmatprep.subr.bf16.mxu0 %v3341_v45  ;;  %2532 = vmatprep.subr.bf16.mxu1 %v3345_v49 }
 0x290   :  { %2502 = vmatpush1.bf16.msra.mxu0 %v3349_v52  ;;  %2534 = vmatpush1.bf16.msra.mxu1 %v3353_v54 }
 0x291   :  { %2536 = vmatprep.subr.bf16.mxu0 %v3236_v2  ;;  %2568 = vmatprep.subr.bf16.mxu1 %v3238_v5 }
 0x346   :  { %v908_v58 = vpop.f32.mrb[4].mxu0  ;;  %v979_v6 = vpop.f32.mrb[4].mxu1 }
 0x347   :  { %v2843_v7 = vadd.f32 %v908_v58, %v3405_v62  ;;  %v910_v9 = vpop.f32.mrb[5].mxu0  ;;  %v981_v10 = vpop.f32.mrb[5].mxu1  ;;  %v2859_v25 = vadd.f32 %v979_v6, %v3414_v28 }
 0x348   :  { %v2844_v13 = vadd.f32 %v910_v9, %v3407_v1  ;;  %v2860_v19 = vadd.f32 %v981_v10, %v3411_v21 }
 0x349   :  { %v2115_v15 = vmul.f32 -1.442695, %v2843_v7 }
 0x34a   :  { %v2116_v16 = vmul.f32 -1.442695, %v2844_v13  ;;  %v2117_v23 = vmul.f32 -1.442695, %v2860_v19 }
 0x34b   :  { %2946 = vpow2.f32 %v2115_v15 }
 0x34c   :  { %2948 = vpow2.f32 %v2116_v16 }
 0x34d   :  { %2950 = vpow2.f32 %v2117_v23 }
 0x34e   :  { %2952 = vtanh.f32 %v2859_v25 }
 0x355   :  { %v2947_v29 = vpop.eup %2946 }
 0x356   :  { %v2949_v32 = vpop.eup %2948  ;;  %v991_v34 = vadd.f32 1.0, %v2947_v29 }
 0x357   :  { %v997_v35 = vadd.f32 1.0, %v2949_v32  ;;  %v2951_v38 = vpop.eup %2950 }
 0x358   :  { %2954 = vrcp.f32 %v991_v34  ;;  %v2953_v39 = vpop.eup %2952  ;;  %v1004_v48 = vadd.f32 1.0, %v2951_v38 }
 0x359   :  { %2956 = vrcp.f32 %v997_v35 }
 0x35a   :  { %2958 = vrcp.f32 %v1004_v48 }
 0x362   :  { %v2955_v42 = vpop.eup %2954 }
 0x363   :  { %v2957_v44 = vpop.eup %2956  ;;  %v1008_v47 = vmul.f32 %v2955_v42, %v2953_v39 }
 0x364   :  { %v1007_v51 = vmul.f32 %v2957_v44, %v3459_v57  ;;  %v2959_v60 = vpop.eup %2958 }
 0x366   :  { %v3501_v55 = vadd.f32 %v1008_v47, %v1007_v51 }
 0x368   :  { %2960 = vtanh.f32 %v3501_v55 }
 0x372   :  { %v2961_v61 = vpop.eup %2960 }
 0x373   :  { %v1011_v3 = vmul.f32 %v2961_v61, %v2959_v60 }
 0x375   :  { %1082 = vmatmul.mubr.f32.vlgmr.msra.gmra.mrb[6].mxu0 %v1011_v3  ;;  %1153 = vmatmul.mubr.f32.vlgmr.msra.gmra.mrb[6].mxu1 %v1011_v3 }
 0x376   :  { %2538 = vmatpush1.bf16.msra.mxu0 %v3240_v11  ;;  %2570 = vmatpush1.bf16.msra.mxu1 %v3243_v14 }
 0x377   :  { %2540 = vmatprep.subr.bf16.mxu0 %v3246_v17  ;;  %2572 = vmatprep.subr.bf16.mxu1 %v3249_v20 }
 0x378   :  { %1256 = vmatprep.mubr.f32.mxu0 %v3143_v0  ;;  %1327 = vmatprep.mubr.f32.mxu1 %v3143_v0 }
 0x37a   :  { %2542 = vmatpush1.bf16.msra.mxu0 %v3253_v24  ;;  %2574 = vmatpush1.bf16.msra.mxu1 %v3257_v27 }
 0x37b   :  { %2544 = vmatprep.subr.bf16.mxu0 %v3261_v30  ;;  %2576 = vmatprep.subr.bf16.mxu1 %v3265_v33 }
 0x37e   :  { %2546 = vmatpush1.bf16.msra.mxu0 %v3269_v37  ;;  %2578 = vmatpush1.bf16.msra.mxu1 %v3273_v40 }
 0x37f   :  { %2548 = vmatprep.subr.bf16.mxu0 %v3277_v43  ;;  %2580 = vmatprep.subr.bf16.mxu1 %v3281_v46 }
 0x382   :  { %2550 = vmatpush1.bf16.msra.mxu0 %v3285_v50  ;;  %2582 = vmatpush1.bf16.msra.mxu1 %v3289_v53 }
 0x383   :  { %2552 = vmatprep.subr.bf16.mxu0 %v3293_v56  ;;  %2584 = vmatprep.subr.bf16.mxu1 %v3297_v59 }
 0x386   :  { %2554 = vmatpush1.bf16.msra.mxu0 %v3301_v63  ;;  %2586 = vmatpush1.bf16.msra.mxu1 %v3305_v4 }
 0x387   :  { %2556 = vmatprep.subr.bf16.mxu0 %v3309_v8  ;;  %2588 = vmatprep.subr.bf16.mxu1 %v3313_v12 }
 0x38a   :  { %2558 = vmatpush1.bf16.msra.mxu0 %v3317_v18  ;;  %2590 = vmatpush1.bf16.msra.mxu1 %v3321_v22 }
 0x38b   :  { %2560 = vmatprep.subr.bf16.mxu0 %v3325_v26  ;;  %2592 = vmatprep.subr.bf16.mxu1 %v3329_v31 }
 0x38e   :  { %2562 = vmatpush1.bf16.msra.mxu0 %v3333_v36  ;;  %2594 = vmatpush1.bf16.msra.mxu1 %v3337_v41 }
 0x38f   :  { %2564 = vmatprep.subr.bf16.mxu0 %v3341_v45  ;;  %2596 = vmatprep.subr.bf16.mxu1 %v3345_v49 }
 0x392   :  { %2566 = vmatpush1.bf16.msra.mxu0 %v3349_v52  ;;  %2598 = vmatpush1.bf16.msra.mxu1 %v3353_v54 }
 0x393   :  { %2600 = vmatprep.subr.bf16.mxu0 %v3236_v2  ;;  %2632 = vmatprep.subr.bf16.mxu1 %v3238_v5 }
 0x448   :  { %v1083_v57 = vpop.f32.mrb[6].mxu0  ;;  %v1154_v58 = vpop.f32.mrb[6].mxu1 }
 0x449   :  { %v2845_v6 = vadd.f32 %v1083_v57, %v3405_v62  ;;  %v1085_v7 = vpop.f32.mrb[7].mxu0  ;;  %v1156_v9 = vpop.f32.mrb[7].mxu1  ;;  %v2861_v23 = vadd.f32 %v1154_v58, %v3414_v28 }
 0x44a   :  { %v2846_v10 = vadd.f32 %v1085_v7, %v3407_v1  ;;  %v2862_v16 = vadd.f32 %v1156_v9, %v3411_v21 }
 0x44b   :  { %v2118_v13 = vmul.f32 -1.442695, %v2845_v6 }
 0x44c   :  { %v2119_v15 = vmul.f32 -1.442695, %v2846_v10  ;;  %v2120_v19 = vmul.f32 -1.442695, %v2862_v16 }
 0x44d   :  { %2962 = vpow2.f32 %v2118_v13 }
 0x44e   :  { %2964 = vpow2.f32 %v2119_v15 }
 0x44f   :  { %2966 = vpow2.f32 %v2120_v19 }
 0x450   :  { %2968 = vtanh.f32 %v2861_v23 }
 0x457   :  { %v2963_v25 = vpop.eup %2962 }
 0x458   :  { %v2965_v29 = vpop.eup %2964  ;;  %v1166_v32 = vadd.f32 1.0, %v2963_v25 }
 0x459   :  { %v1172_v34 = vadd.f32 1.0, %v2965_v29  ;;  %v2967_v35 = vpop.eup %2966 }
 0x45a   :  { %2970 = vrcp.f32 %v1166_v32  ;;  %v2969_v38 = vpop.eup %2968  ;;  %v1179_v47 = vadd.f32 1.0, %v2967_v35 }
 0x45b   :  { %2972 = vrcp.f32 %v1172_v34 }
 0x45c   :  { %2974 = vrcp.f32 %v1179_v47 }
 0x464   :  { %v2971_v39 = vpop.eup %2970 }
 0x465   :  { %v2973_v42 = vpop.eup %2972  ;;  %v1183_v44 = vmul.f32 %v2971_v39, %v2969_v38 }
 0x466   :  { %v1182_v48 = vmul.f32 %v2973_v42, %v3501_v55  ;;  %v2975_v60 = vpop.eup %2974 }
 0x468   :  { %v3543_v51 = vadd.f32 %v1183_v44, %v1182_v48 }
 0x46a   :  { %2976 = vtanh.f32 %v3543_v51 }
 0x474   :  { %v2977_v61 = vpop.eup %2976 }
 0x475   :  { %v1186_v3 = vmul.f32 %v2977_v61, %v2975_v60 }
 0x477   :  { %1257 = vmatmul.mubr.f32.vlgmr.msra.gmra.mrb[8].mxu0 %v1186_v3  ;;  %1328 = vmatmul.mubr.f32.vlgmr.msra.gmra.mrb[8].mxu1 %v1186_v3 }
 0x478   :  { %2602 = vmatpush1.bf16.msra.mxu0 %v3240_v11  ;;  %2634 = vmatpush1.bf16.msra.mxu1 %v3243_v14 }
 0x479   :  { %2604 = vmatprep.subr.bf16.mxu0 %v3246_v17  ;;  %2636 = vmatprep.subr.bf16.mxu1 %v3249_v20 }
 0x47a   :  { %1431 = vmatprep.mubr.f32.mxu0 %v3143_v0  ;;  %1502 = vmatprep.mubr.f32.mxu1 %v3143_v0 }
 0x47c   :  { %2606 = vmatpush1.bf16.msra.mxu0 %v3253_v24  ;;  %2638 = vmatpush1.bf16.msra.mxu1 %v3257_v27 }
 0x47d   :  { %2608 = vmatprep.subr.bf16.mxu0 %v3261_v30  ;;  %2640 = vmatprep.subr.bf16.mxu1 %v3265_v33 }
 0x480   :  { %2610 = vmatpush1.bf16.msra.mxu0 %v3269_v37  ;;  %2642 = vmatpush1.bf16.msra.mxu1 %v3273_v40 }
 0x481   :  { %2612 = vmatprep.subr.bf16.mxu0 %v3277_v43  ;;  %2644 = vmatprep.subr.bf16.mxu1 %v3281_v46 }
 0x484   :  { %2614 = vmatpush1.bf16.msra.mxu0 %v3285_v50  ;;  %2646 = vmatpush1.bf16.msra.mxu1 %v3289_v53 }
 0x485   :  { %2616 = vmatprep.subr.bf16.mxu0 %v3293_v56  ;;  %2648 = vmatprep.subr.bf16.mxu1 %v3297_v59 }
 0x488   :  { %2618 = vmatpush1.bf16.msra.mxu0 %v3301_v63  ;;  %2650 = vmatpush1.bf16.msra.mxu1 %v3305_v4 }
 0x489   :  { %2620 = vmatprep.subr.bf16.mxu0 %v3309_v8  ;;  %2652 = vmatprep.subr.bf16.mxu1 %v3313_v12 }
 0x48c   :  { %2622 = vmatpush1.bf16.msra.mxu0 %v3317_v18  ;;  %2654 = vmatpush1.bf16.msra.mxu1 %v3321_v22 }
 0x48d   :  { %2624 = vmatprep.subr.bf16.mxu0 %v3325_v26  ;;  %2656 = vmatprep.subr.bf16.mxu1 %v3329_v31 }
 0x490   :  { %2626 = vmatpush1.bf16.msra.mxu0 %v3333_v36  ;;  %2658 = vmatpush1.bf16.msra.mxu1 %v3337_v41 }
 0x491   :  { %2628 = vmatprep.subr.bf16.mxu0 %v3341_v45  ;;  %2660 = vmatprep.subr.bf16.mxu1 %v3345_v49 }
 0x494   :  { %2630 = vmatpush1.bf16.msra.mxu0 %v3349_v52  ;;  %2662 = vmatpush1.bf16.msra.mxu1 %v3353_v54 }
 0x495   :  { %2664 = vmatprep.subr.bf16.mxu0 %v3236_v2  ;;  %2696 = vmatprep.subr.bf16.mxu1 %v3238_v5 }
 0x54a   :  { %v1258_v55 = vpop.f32.mrb[8].mxu0  ;;  %v1329_v57 = vpop.f32.mrb[8].mxu1 }
 0x54b   :  { %v2847_v58 = vadd.f32 %v1258_v55, %v3405_v62  ;;  %v1260_v6 = vpop.f32.mrb[9].mxu0  ;;  %v1331_v7 = vpop.f32.mrb[9].mxu1  ;;  %v2863_v19 = vadd.f32 %v1329_v57, %v3414_v28 }
 0x54c   :  { %v2848_v9 = vadd.f32 %v1260_v6, %v3407_v1  ;;  %v2864_v15 = vadd.f32 %v1331_v7, %v3411_v21 }
 0x54d   :  { %v2121_v10 = vmul.f32 -1.442695, %v2847_v58 }
 0x54e   :  { %v2122_v13 = vmul.f32 -1.442695, %v2848_v9  ;;  %v2123_v16 = vmul.f32 -1.442695, %v2864_v15 }
 0x54f   :  { %2978 = vpow2.f32 %v2121_v10 }
 0x550   :  { %2980 = vpow2.f32 %v2122_v13 }
 0x551   :  { %2982 = vpow2.f32 %v2123_v16 }
 0x552   :  { %2984 = vtanh.f32 %v2863_v19 }
 0x559   :  { %v2979_v23 = vpop.eup %2978 }
 0x55a   :  { %v2981_v25 = vpop.eup %2980  ;;  %v1341_v29 = vadd.f32 1.0, %v2979_v23 }
 0x55b   :  { %v1347_v32 = vadd.f32 1.0, %v2981_v25  ;;  %v2983_v34 = vpop.eup %2982 }
 0x55c   :  { %2986 = vrcp.f32 %v1341_v29  ;;  %v2985_v35 = vpop.eup %2984  ;;  %v1354_v44 = vadd.f32 1.0, %v2983_v34 }
 0x55d   :  { %2988 = vrcp.f32 %v1347_v32 }
 0x55e   :  { %2990 = vrcp.f32 %v1354_v44 }
 0x566   :  { %v2987_v38 = vpop.eup %2986 }
 0x567   :  { %v2989_v39 = vpop.eup %2988  ;;  %v1358_v42 = vmul.f32 %v2987_v38, %v2985_v35 }
 0x568   :  { %v1357_v47 = vmul.f32 %v2989_v39, %v3543_v51  ;;  %v2991_v60 = vpop.eup %2990 }
 0x56a   :  { %v3585_v48 = vadd.f32 %v1358_v42, %v1357_v47 }
 0x56c   :  { %2992 = vtanh.f32 %v3585_v48 }
 0x576   :  { %v2993_v61 = vpop.eup %2992 }
 0x577   :  { %v1361_v3 = vmul.f32 %v2993_v61, %v2991_v60  ;;  %v1891_v61 = vld [vmem:[%s3811_s4 + $0x18] sm:$0xff] }
 0x579   :  { %1432 = vmatmul.mubr.f32.vlgmr.msra.gmra.mrb[10].mxu0 %v1361_v3  ;;  %1503 = vmatmul.mubr.f32.vlgmr.msra.gmra.mrb[10].mxu1 %v1361_v3 }
 0x57a   :  { %2666 = vmatpush1.bf16.msra.mxu0 %v3240_v11  ;;  %2698 = vmatpush1.bf16.msra.mxu1 %v3243_v14 }
 0x57b   :  { %2668 = vmatprep.subr.bf16.mxu0 %v3246_v17  ;;  %2700 = vmatprep.subr.bf16.mxu1 %v3249_v20 }
 0x57c   :  { %1606 = vmatprep.mubr.f32.mxu0 %v3143_v0  ;;  %1677 = vmatprep.mubr.f32.mxu1 %v3143_v0 }
 0x57e   :  { %2670 = vmatpush1.bf16.msra.mxu0 %v3253_v24  ;;  %2702 = vmatpush1.bf16.msra.mxu1 %v3257_v27 }
 0x57f   :  { %2672 = vmatprep.subr.bf16.mxu0 %v3261_v30  ;;  %2704 = vmatprep.subr.bf16.mxu1 %v3265_v33 }
 0x582   :  { %2674 = vmatpush1.bf16.msra.mxu0 %v3269_v37  ;;  %2706 = vmatpush1.bf16.msra.mxu1 %v3273_v40 }
 0x583   :  { %2676 = vmatprep.subr.bf16.mxu0 %v3277_v43  ;;  %2708 = vmatprep.subr.bf16.mxu1 %v3281_v46 }
 0x586   :  { %2678 = vmatpush1.bf16.msra.mxu0 %v3285_v50  ;;  %2710 = vmatpush1.bf16.msra.mxu1 %v3289_v53 }
 0x587   :  { %2680 = vmatprep.subr.bf16.mxu0 %v3293_v56  ;;  %2712 = vmatprep.subr.bf16.mxu1 %v3297_v59 }
 0x58a   :  { %2682 = vmatpush1.bf16.msra.mxu0 %v3301_v63  ;;  %2714 = vmatpush1.bf16.msra.mxu1 %v3305_v4 }
 0x58b   :  { %2684 = vmatprep.subr.bf16.mxu0 %v3309_v8  ;;  %2716 = vmatprep.subr.bf16.mxu1 %v3313_v12 }
 0x58e   :  { %2686 = vmatpush1.bf16.msra.mxu0 %v3317_v18  ;;  %2718 = vmatpush1.bf16.msra.mxu1 %v3321_v22 }
 0x58f   :  { %2688 = vmatprep.subr.bf16.mxu0 %v3325_v26  ;;  %2720 = vmatprep.subr.bf16.mxu1 %v3329_v31 }
 0x592   :  { %2690 = vmatpush1.bf16.msra.mxu0 %v3333_v36  ;;  %2722 = vmatpush1.bf16.msra.mxu1 %v3337_v41 }
 0x593   :  { %2692 = vmatprep.subr.bf16.mxu0 %v3341_v45  ;;  %2724 = vmatprep.subr.bf16.mxu1 %v3345_v49 }
 0x596   :  { %2694 = vmatpush1.bf16.msra.mxu0 %v3349_v52  ;;  %2726 = vmatpush1.bf16.msra.mxu1 %v3353_v54 }
 0x597   :  { %2728 = vmatprep.subr.bf16.mxu0 %v3236_v2  ;;  %2760 = vmatprep.subr.bf16.mxu1 %v3238_v5 }
 0x64c   :  { %v1433_v51 = vpop.f32.mrb[10].mxu0  ;;  %v1504_v55 = vpop.f32.mrb[10].mxu1 }
 0x64d   :  { %v2849_v57 = vadd.f32 %v1433_v51, %v3405_v62  ;;  %v1435_v58 = vpop.f32.mrb[11].mxu0  ;;  %v1506_v6 = vpop.f32.mrb[11].mxu1  ;;  %v2865_v16 = vadd.f32 %v1504_v55, %v3414_v28  ;;  %v1892_v51 = vld [vmem:[%s3811_s4 + $0x20] sm:$0xff]  ;;  %v1893_v55 = vld [vmem:[%s3811_s4 + $0x28] sm:$0xff] }
 0x64e   :  { %v2850_v7 = vadd.f32 %v1435_v58, %v3407_v1  ;;  %v2866_v13 = vadd.f32 %v1506_v6, %v3411_v21  ;;  %v1894_v58 = vld [vmem:[%s3811_s4 + $0x30] sm:$0xff]  ;;  %v1895_v6 = vld [vmem:[%s3811_s4 + $0x38] sm:$0xff] }
 0x64f   :  { %v2124_v9 = vmul.f32 -1.442695, %v2849_v57  ;;  %v2798_v57 = vpack.c.bf16 %v1893_v55, %v1892_v51 }
 0x650   :  { %v2125_v10 = vmul.f32 -1.442695, %v2850_v7  ;;  %v2126_v15 = vmul.f32 -1.442695, %v2866_v13  ;;  %v2801_v7 = vpack.c.bf16 %v1895_v6, %v1894_v58  ;;  %v1996_v58 = vld [vmem:[%s3813_s6 + $0x70] sm:$0xff]  ;;  %v1997_v6 = vld [vmem:[%s3813_s6 + $0x78] sm:$0xff] }
 0x651   :  { %2994 = vpow2.f32 %v2124_v9  ;;  %v1896_v9 = vld [vmem:[%s3811_s4 + $0x40] sm:$0xff] }
 0x652   :  { %2996 = vpow2.f32 %v2125_v10  ;;  %v1897_v10 = vld [vmem:[%s3811_s4 + $0x48] sm:$0xff] }
 0x653   :  { %2998 = vpow2.f32 %v2126_v15  ;;  %v2804_v13 = vpack.c.bf16 %v1897_v10, %v1896_v9  ;;  %v1898_v15 = vld [vmem:[%s3811_s4 + $0x50] sm:$0xff] }
 0x654   :  { %3000 = vtanh.f32 %v2865_v16  ;;  %v1899_v16 = vld [vmem:[%s3811_s4 + $0x58] sm:$0xff] }
 0x65b   :  { %v2995_v2 = vpop.eup %2994 }
 0x65c   :  { %v2997_v19 = vpop.eup %2996  ;;  %v1516_v5 = vadd.f32 1.0, %v2995_v2  ;;  %v2807_v2 = vpack.c.bf16 %v1899_v16, %v1898_v15  ;;  %v2134_v16 = vld [vmem:[%s3814_s7] ss:$0 sm:$0xff] }
 0x65d   :  { %v1522_v23 = vadd.f32 1.0, %v2997_v19  ;;  %v2999_v25 = vpop.eup %2998  ;;  %v1900_v19 = vld [vmem:[%s3811_s4 + $0x60] sm:$0xff] }
 0x65e   :  { %3002 = vrcp.f32 %v1516_v5  ;;  %v3001_v29 = vpop.eup %3000  ;;  %v1529_v38 = vadd.f32 1.0, %v2999_v25  ;;  %v1901_v5 = vld [vmem:[%s3811_s4 + $0x68] sm:$0xff]  ;;  %v1902_v25 = vld [vmem:[%s3811_s4 + $0x70] sm:$0xff] }
 0x65f   :  { %3004 = vrcp.f32 %v1522_v23  ;;  %v2810_v23 = vpack.c.bf16 %v1901_v5, %v1900_v19 }
 0x660   :  { %3006 = vrcp.f32 %v1529_v38 }
 0x668   :  { %v3003_v32 = vpop.eup %3002 }
 0x669   :  { %v3005_v34 = vpop.eup %3004  ;;  %v1533_v35 = vmul.f32 %v3003_v32, %v3001_v29  ;;  %v1903_v29 = vld [vmem:[%s3811_s4 + $0x78] sm:$0xff] }
 0x66a   :  { %v1532_v39 = vmul.f32 %v3005_v34, %v3585_v48  ;;  %v3007_v44 = vpop.eup %3006  ;;  %v1890_v48 = vld [vmem:[%s3811_s4 + $0x10] sm:$0xff]  ;;  %v2813_v32 = vpack.c.bf16 %v1903_v29, %v1902_v25  ;;  %v1983_v34 = vld [vmem:[%s3813_s6 + $0x8] sm:$0xff] }
 0x66b   :  { %v2795_v3 = vpack.c.bf16 %v1891_v61, %v1890_v48 }
 0x66c   :  { %v3627_v42 = vadd.f32 %v1533_v35, %v1532_v39  ;;  %v1984_v35 = vld [vmem:[%s3813_s6 + $0x10] sm:$0xff]  ;;  %v1985_v39 = vld [vmem:[%s3813_s6 + $0x18] sm:$0xff] }
 0x66e   :  { %3008 = vtanh.f32 %v3627_v42 }
 0x678   :  { %v3009_v47 = vpop.eup %3008 }
 0x679   :  { %v1536_v60 = vmul.f32 %v3009_v47, %v3007_v44  ;;  %v1986_v44 = vld [vmem:[%s3813_s6 + $0x20] sm:$0xff]  ;;  %v1987_v47 = vld [vmem:[%s3813_s6 + $0x28] sm:$0xff] }
 0x67b   :  { %1607 = vmatmul.mubr.f32.vlgmr.msra.gmra.mrb[12].mxu0 %v1536_v60  ;;  %1678 = vmatmul.mubr.f32.vlgmr.msra.gmra.mrb[12].mxu1 %v1536_v60  ;;  %v2822_v60 = vpack.c.bf16 %v1987_v47, %v1986_v44 }
 0x67c   :  { %2730 = vmatpush1.bf16.msra.mxu0 %v3240_v11  ;;  %2762 = vmatpush1.bf16.msra.mxu1 %v3243_v14 }
 0x67d   :  { %2732 = vmatprep.subr.bf16.mxu0 %v3246_v17  ;;  %2764 = vmatprep.subr.bf16.mxu1 %v3249_v20 }
 0x67e   :  { %1781 = vmatprep.mubr.f32.mxu0 %v3143_v0  ;;  %1852 = vmatprep.mubr.f32.mxu1 %v3143_v0 }
 0x680   :  { %2734 = vmatpush1.bf16.msra.mxu0 %v3253_v24  ;;  %2766 = vmatpush1.bf16.msra.mxu1 %v3257_v27 }
 0x681   :  { %2736 = vmatprep.subr.bf16.mxu0 %v3261_v30  ;;  %2768 = vmatprep.subr.bf16.mxu1 %v3265_v33 }
 0x684   :  { %2738 = vmatpush1.bf16.msra.mxu0 %v3269_v37  ;;  %2770 = vmatpush1.bf16.msra.mxu1 %v3273_v40 }
 0x685   :  { %2740 = vmatprep.subr.bf16.mxu0 %v3277_v43  ;;  %2772 = vmatprep.subr.bf16.mxu1 %v3281_v46 }
 0x688   :  { %2742 = vmatpush1.bf16.msra.mxu0 %v3285_v50  ;;  %2774 = vmatpush1.bf16.msra.mxu1 %v3289_v53 }
 0x689   :  { %2744 = vmatprep.subr.bf16.mxu0 %v3293_v56  ;;  %2776 = vmatprep.subr.bf16.mxu1 %v3297_v59 }
 0x68c   :  { %2746 = vmatpush1.bf16.msra.mxu0 %v3301_v63  ;;  %2778 = vmatpush1.bf16.msra.mxu1 %v3305_v4 }
 0x68d   :  { %2748 = vmatprep.subr.bf16.mxu0 %v3309_v8  ;;  %2780 = vmatprep.subr.bf16.mxu1 %v3313_v12 }
 0x690   :  { %2750 = vmatpush1.bf16.msra.mxu0 %v3317_v18  ;;  %2782 = vmatpush1.bf16.msra.mxu1 %v3321_v22 }
 0x691   :  { %2752 = vmatprep.subr.bf16.mxu0 %v3325_v26  ;;  %2784 = vmatprep.subr.bf16.mxu1 %v3329_v31 }
 0x694   :  { %2754 = vmatpush1.bf16.msra.mxu0 %v3333_v36  ;;  %2786 = vmatpush1.bf16.msra.mxu1 %v3337_v41 }
 0x695   :  { %2756 = vmatprep.subr.bf16.mxu0 %v3341_v45  ;;  %2788 = vmatprep.subr.bf16.mxu1 %v3345_v49  ;;  %v1888_v45 = vld [vmem:[%s3811_s4] sm:$0xff]  ;;  %v1889_v49 = vld [vmem:[%s3811_s4 + $0x8] sm:$0xff] }
 0x698   :  { %2758 = vmatpush1.bf16.msra.mxu0 %v3349_v52  ;;  %2790 = vmatpush1.bf16.msra.mxu1 %v3353_v54  ;;  %v2792_v52 = vpack.c.bf16 %v1889_v49, %v1888_v45  ;;  %v3144_v54 = vmov 0.0|0.0  }
 0x699   :  { %2791 = vmatprep.subr.bf16.mxu0 %v3144_v54  ;;  %2815 = vmatprep.subr.bf16.mxu1 %v3144_v54 }
 0x74e   :  { %v1608_v11 = vpop.f32.mrb[12].mxu0  ;;  %v1679_v14 = vpop.f32.mrb[12].mxu1 }
 0x74f   :  { %v2851_v17 = vadd.f32 %v1608_v11, %v3405_v62  ;;  %v1610_v20 = vpop.f32.mrb[13].mxu0  ;;  %v1681_v24 = vpop.f32.mrb[13].mxu1  ;;  %v2867_v43 = vadd.f32 %v1679_v14, %v3414_v28  ;;  %v1988_v11 = vld [vmem:[%s3813_s6 + $0x30] sm:$0xff]  ;;  %v1989_v14 = vld [vmem:[%s3813_s6 + $0x38] sm:$0xff] }
 0x750   :  { %v2852_v27 = vadd.f32 %v1610_v20, %v3407_v1  ;;  %v2868_v37 = vadd.f32 %v1681_v24, %v3411_v21  ;;  %v1990_v20 = vld [vmem:[%s3813_s6 + $0x40] sm:$0xff]  ;;  %v1991_v24 = vld [vmem:[%s3813_s6 + $0x48] sm:$0xff] }
 0x751   :  { %v2127_v30 = vmul.f32 -1.442695, %v2851_v17  ;;  %v2825_v17 = vpack.c.bf16 %v1989_v14, %v1988_v11 }
 0x752   :  { %v2128_v33 = vmul.f32 -1.442695, %v2852_v27  ;;  %v2129_v40 = vmul.f32 -1.442695, %v2868_v37  ;;  %v2828_v27 = vpack.c.bf16 %v1991_v24, %v1990_v20 }
 0x753   :  { %3010 = vpow2.f32 %v2127_v30  ;;  %v1992_v30 = vld [vmem:[%s3813_s6 + $0x50] sm:$0xff] }
 0x754   :  { %3012 = vpow2.f32 %v2128_v33  ;;  %v1993_v33 = vld [vmem:[%s3813_s6 + $0x58] sm:$0xff] }
 0x755   :  { %3014 = vpow2.f32 %v2129_v40  ;;  %v2831_v37 = vpack.c.bf16 %v1993_v33, %v1992_v30  ;;  %v1994_v40 = vld [vmem:[%s3813_s6 + $0x60] sm:$0xff] }
 0x756   :  { %3016 = vtanh.f32 %v2867_v43  ;;  %v1995_v43 = vld [vmem:[%s3813_s6 + $0x68] sm:$0xff] }
 0x75d   :  { %v3011_v46 = vpop.eup %3010 }
 0x75e   :  { %v3013_v50 = vpop.eup %3012  ;;  %v1691_v53 = vadd.f32 1.0, %v3011_v46  ;;  %v2834_v46 = vpack.c.bf16 %v1995_v43, %v1994_v40 }
 0x75f   :  { %v1697_v56 = vadd.f32 1.0, %v3013_v50  ;;  %v3015_v59 = vpop.eup %3014 }
 0x760   :  { %3018 = vrcp.f32 %v1691_v53  ;;  %v3017_v63 = vpop.eup %3016  ;;  %v1704_v18 = vadd.f32 1.0, %v3015_v59 }
 0x761   :  { %3020 = vrcp.f32 %v1697_v56 }
 0x762   :  { %3022 = vrcp.f32 %v1704_v18 }
 0x76a   :  { %v3019_v4 = vpop.eup %3018 }
 0x76b   :  { %v3021_v8 = vpop.eup %3020  ;;  %v1708_v12 = vmul.f32 %v3019_v4, %v3017_v63 }
 0x76c   :  { %v1707_v22 = vmul.f32 %v3021_v8, %v3627_v42  ;;  %v3023_v31 = vpop.eup %3022  ;;  %v2819_v42 = vpack.c.bf16 %v1985_v39, %v1984_v35 }
 0x76e   :  { %v3667_v26 = vadd.f32 %v1708_v12, %v1707_v22 }
 0x770   :  { %3024 = vtanh.f32 %v3667_v26 }
 0x77a   :  { %v3025_v36 = vpop.eup %3024 }
 0x77b   :  { %v1711_v41 = vmul.f32 %v3025_v36, %v3023_v31 }
 0x77d   :  { %1782 = vmatmul.mubr.f32.vlgmr.msra.gmra.mrb[14].mxu0 %v1711_v41  ;;  %1853 = vmatmul.mubr.f32.vlgmr.msra.gmra.mrb[14].mxu1 %v1711_v41 }
 0x77e   :  { %2793 = vmatpush3.bf16.msra.mxu0 %v2792_v52  ;;  %2201 = vmatprep.mubr.msk.f32.mxu0 %vm3145_vm1, %v3143_v0 }
 0x77f   :  { %2794 = vmatprep.subr.bf16.mxu0 %v3144_v54  ;;  %2236 = vmatprep.mubr.msk.f32.mxu1 %vm3145_vm1, %v3143_v0  ;;  %v1982_v0 = vld [vmem:[%s3813_s6] sm:$0xff]  ;;  %s3108_s6 = scalar_lea.vmem %s2084_s13, 128 }
 0x780   :  { %v2816_v38 = vpack.c.bf16 %v1983_v34, %v1982_v0  ;;  %p3109_p10 = scmp.ne.s32.totalorder %s2084_s13, %s3108_s6  ;;  %p3114_p12 = scmp.lt.s32.totalorder %s3108_s6, %s3108_s6 }
 0x782   :  { %2796 = vmatpush3.bf16.msra.mxu0 %v2795_v3  ;;  %2817 = vmatpush3.bf16.msra.mxu1 %v2816_v38  ;;  %p3115_p13 = por %p3114_p12, %p3113_p11 }
 0x783   :  { %2797 = vmatprep.subr.bf16.mxu0 %v3144_v54  ;;  %2818 = vmatprep.subr.bf16.mxu1 %v3144_v54 }
 0x784   :  { %p3116_p0 = pnand %p3115_p13, %p3109_p10 }
 0x786   :  { %2799 = vmatpush3.bf16.msra.mxu0 %v2798_v57  ;;  %2820 = vmatpush3.bf16.msra.mxu1 %v2819_v42 }
 0x787   :  { %2800 = vmatprep.subr.bf16.mxu0 %v3144_v54  ;;  %2821 = vmatprep.subr.bf16.mxu1 %v3144_v54 }
 0x78a   :  { %2802 = vmatpush3.bf16.msra.mxu0 %v2801_v7  ;;  %2823 = vmatpush3.bf16.msra.mxu1 %v2822_v60  ;;  %v2837_v7 = vpack.c.bf16 %v1997_v6, %v1996_v58 }
 0x78b   :  { %2803 = vmatprep.subr.bf16.mxu0 %v3144_v54  ;;  %2824 = vmatprep.subr.bf16.mxu1 %v3144_v54 }
 0x78e   :  { %2805 = vmatpush3.bf16.msra.mxu0 %v2804_v13  ;;  %2826 = vmatpush3.bf16.msra.mxu1 %v2825_v17 }
 0x78f   :  { %2806 = vmatprep.subr.bf16.mxu0 %v3144_v54  ;;  %2827 = vmatprep.subr.bf16.mxu1 %v3144_v54 }
 0x792   :  { %2808 = vmatpush3.bf16.msra.mxu0 %v2807_v2  ;;  %2829 = vmatpush3.bf16.msra.mxu1 %v2828_v27 }
 0x793   :  { %2809 = vmatprep.subr.bf16.mxu0 %v3144_v54  ;;  %2830 = vmatprep.subr.bf16.mxu1 %v3144_v54 }
 0x796   :  { %2811 = vmatpush3.bf16.msra.mxu0 %v2810_v23  ;;  %2832 = vmatpush3.bf16.msra.mxu1 %v2831_v37 }
 0x797   :  { %2812 = vmatprep.subr.bf16.mxu0 %v3144_v54  ;;  %2833 = vmatprep.subr.bf16.mxu1 %v3144_v54 }
 0x79a   :  { %2814 = vmatpush3.bf16.msra.mxu0 %v2813_v32  ;;  %2835 = vmatpush3.bf16.msra.mxu1 %v2834_v46 }
 0x79b   :  { %2836 = vmatprep.subr.bf16.mxu1 %v3144_v54 }
 0x79e   :  { %2838 = vmatpush3.bf16.msra.mxu1 %v2837_v7 }
 0x850   :  { %v1783_v50 = vpop.f32.mrb[14].mxu0  ;;  %v1854_v53 = vpop.f32.mrb[14].mxu1 }
 0x851   :  { %v2853_v56 = vadd.f32 %v1783_v50, %v3405_v62  ;;  %v1785_v59 = vpop.f32.mrb[15].mxu0  ;;  %v1856_v63 = vpop.f32.mrb[15].mxu1  ;;  %v2869_v31 = vadd.f32 %v1854_v53, %v3414_v28 }
 0x852   :  { %v2854_v4 = vadd.f32 %v1785_v59, %v3407_v1  ;;  %v2870_v18 = vadd.f32 %v1856_v63, %v3411_v21 }
 0x853   :  { %v2130_v8 = vmul.f32 -1.442695, %v2853_v56 }
 0x854   :  { %v2131_v12 = vmul.f32 -1.442695, %v2854_v4  ;;  %v2132_v22 = vmul.f32 -1.442695, %v2870_v18 }
 0x855   :  { %3026 = vpow2.f32 %v2130_v8 }
 0x856   :  { %3028 = vpow2.f32 %v2131_v12 }
 0x857   :  { %3030 = vpow2.f32 %v2132_v22 }
 0x858   :  { %3032 = vtanh.f32 %v2869_v31 }
 0x85f   :  { %v3027_v36 = vpop.eup %3026 }
 0x860   :  { %v3029_v41 = vpop.eup %3028  ;;  %v1866_v45 = vadd.f32 1.0, %v3027_v36 }
 0x861   :  { %v1872_v49 = vadd.f32 1.0, %v3029_v41  ;;  %v3031_v62 = vpop.eup %3030 }
 0x862   :  { %3034 = vrcp.f32 %v1866_v45  ;;  %v3033_v52 = vpop.eup %3032  ;;  %v1879_v61 = vadd.f32 1.0, %v3031_v62 }
 0x863   :  { %3036 = vrcp.f32 %v1872_v49 }
 0x864   :  { %3038 = vrcp.f32 %v1879_v61 }
 0x86c   :  { %v3035_v1 = vpop.eup %3034 }
 0x86d   :  { %v3037_v54 = vpop.eup %3036  ;;  %v1883_v48 = vmul.f32 %v3035_v1, %v3033_v52 }
 0x86e   :  { %v1882_v3 = vmul.f32 %v3037_v54, %v3667_v26  ;;  %v3039_v28 = vpop.eup %3038  ;;  %v2133_v26 = vld [vmem:[%s3812_s5] ss:$0 sm:$0xff] }
 0x870   :  { %v1884_v21 = vadd.f32 %v1883_v48, %v1882_v3 }
 0x872   :  { %3040 = vtanh.f32 %v1884_v21 }
 0x87c   :  { %v3041_v51 = vpop.eup %3040 }
 0x87d   :  { %v1886_v55 = vmul.f32 %v3041_v51, %v3039_v28 }
 0x87f   :  { %v1887_v57 = vmax.f32 %v1886_v55, 0.0 }
 0x881   :  { %2202 = vmatmul.mubr.f32.vlgmr.msra.gmra.mrb[16].mxu0 %v1887_v57 }
 0x954   :  { %v1977_v9 = vpop.f32.mrb[16].mxu0 }
 0x955   :  { %v1978_v10 = vadd.f32 %v2133_v26, %v1977_v9  ;;  %v2203_v13 = vpop.f32.mrb[17].mxu0 }
 0x957   :  { %v1981_v15 = vmax.f32 %v1978_v10, 0.0 }
 0x959   :  { %2237 = vmatmul.mubr.f32.vlgmr.msra.gmra.mrb[16].mxu1 %v1981_v15 }
 0xa2c   :  { %v2071_v2 = vpop.f32.mrb[16].mxu1 }
 0xa2d   :  { %v2072_v19 = vadd.f32 %v2134_v16, %v2071_v2  ;;  %v2238_v5 = vpop.f32.mrb[17].mxu1 }
 0xa2f   :  { %2076 = vst.msk [vmem:[#allocation9] sm:$0xff] %vm2075_vm2, %v2072_v19 }
 0xa30   :  { %3119 = shalt.err (!%p3116_p0)
}
 0xa31   :  { %s3120_s17 = scalar_lea.hbm %s3815_s8, 128 }
 0xa32   :  { %p3121_p1 = scmp.ne.s32.totalorder %s3815_s8, %s3120_s17  ;;  %p3124_p2 = scmp.lt.u32.totalorder %s3120_s17, %s3815_s8 }
 0xa34   :  { %p3126_p3 = pnand %p3124_p2, %p3121_p1 }
 0xa36   :  { %3129 = shalt.err (!%p3126_p3)
}
 0xa37   :  { %2086 = dma.vmem_to_hbm [thread:$0]  %s2084_s13, 128, %s3815_s8, [#allocation5]  }
 0xa38   :  { %3134 = dma.done.wait [#allocation5], 128  }
 0xa39   :  { %3135 = vsyncadd [#allocation5], 4294967168 }
 0xa3a   :  { %2090 = vsyncpa [#allocation4], 1 }
 0xa3b   :  { %2091 = vsyncpa [#allocation7], 1 }
 0xa3c   :  { %2092 = vsyncpa [#allocation5], 1 }

</bundles_post_ra>
